<compile_context>
chip_gen: v7x
topology: tpu7x:2x2x1
jax: 0.10.0
libtpu: 0.0.40
codegen_flags: <defaults>
</compile_context>

<pallas_src>
import jax
import jax.numpy as jnp
from jax import lax
from jax.experimental import pallas as pl
from jax.experimental.pallas import tpu as pltpu


def _conv_out(n, k, s):
    return (n - k) // s + 1


def _round_up(n, m):
    return ((n + m - 1) // m) * m


# ----------------------------------------------------------------------------
# Fused kernel: 3 x (conv-as-FC matmul + cReLU) -> dueling head, all in VMEM.
# One grid step processes TB samples ([TB, ...] sublane-stacked).
# ----------------------------------------------------------------------------
def _dueling_dqn_kernel(
    x_ref,                    # [TB, C*H*W]        NCHW-flattened raw pixels
    w1_ref, b1_ref,           # [C*H*W, 8*np1],    [1, 8*np1]   (1/255 folded)
    w2_ref, b2_ref,           # [16*np1, 8*np2],   [1, 8*np2]
    w3_ref, b3_ref,           # [16*np2, 8*np3],   [1, 8*np3]
    wh1_ref, bh1_ref,         # [16*np3, 2*hid],   [1, 2*hid]   (adv | value)
    wh2_ref, bh2_ref,         # [2*hid, A+1],      [1, A+1]     (block-diag)
    o_ref,                    # [TB, A]
):
    f32 = jnp.float32
    acts = o_ref.shape[1]

    def crelu(y):             # lane-dim concat at a 128-aligned boundary
        return jnp.concatenate([jnp.maximum(y, 0.0), jnp.maximum(-y, 0.0)],
                               axis=1)

    x = x_ref[...]
    y1 = jnp.dot(x, w1_ref[...], preferred_element_type=f32) + b1_ref[...]
    a1 = crelu(y1)                                            # [TB, 16*np1]
    y2 = jnp.dot(a1, w2_ref[...], preferred_element_type=f32) + b2_ref[...]
    a2 = crelu(y2)                                            # [TB, 16*np2]
    y3 = jnp.dot(a2, w3_ref[...], preferred_element_type=f32) + b3_ref[...]
    feat = crelu(y3)                                          # [TB, 16*np3]

    h = jnp.maximum(
        jnp.dot(feat, wh1_ref[...], preferred_element_type=f32) + bh1_ref[...],
        0.0)                                                  # [TB, 2*hid]
    q = jnp.dot(h, wh2_ref[...], preferred_element_type=f32) + bh2_ref[...]
    adv = q[:, :acts]                                         # [TB, A]
    val = q[:, acts:acts + 1]                                 # [TB, 1]
    o_ref[...] = val + adv - jnp.mean(adv, axis=1, keepdims=True)


# ----------------------------------------------------------------------------
# Wrapper: conv -> dense-FC weight expansion (layout only) + pallas_call.
# ----------------------------------------------------------------------------
def _conv_fc_weight(w_hwio, in_h, in_w, stride, np_in, np_out):
    """Dense [cin*np_in, cout*np_out] matrix implementing a VALID conv on
    channel-major-flattened activations (index = c*np_in + y*in_w + x)."""
    kh, kw, cin, cout = w_hwio.shape
    oh, ow = _conv_out(in_h, kh, stride), _conv_out(in_w, kw, stride)
    cols = []
    for oy in range(oh):
        for ox in range(ow):
            blk = jnp.pad(w_hwio,
                          ((oy * stride, in_h - kh - oy * stride),
                           (ox * stride, in_w - kw - ox * stride),
                           (0, 0), (0, 0)))          # [in_h, in_w, cin, cout]
            cols.append(blk.reshape(in_h * in_w, cin, cout))
    w = jnp.stack(cols, axis=-1)                     # [in_h*in_w, cin, cout, oh*ow]
    w = jnp.pad(w, ((0, np_in - in_h * in_w), (0, 0), (0, 0),
                    (0, np_out - oh * ow)))
    w = jnp.transpose(w, (1, 0, 2, 3))               # [cin, np_in, cout, np_out]
    return w.reshape(cin * np_in, cout * np_out)


def _conv_fc_bias(b, n_real, np_out):
    cout = b.shape[-1]
    bb = jnp.broadcast_to(b.reshape(cout, 1), (cout, n_real))
    bb = jnp.pad(bb, ((0, 0), (0, np_out - n_real)))
    return bb.reshape(1, cout * np_out)


def dueling_dqn_forward(params, x_nchw):
    """Full DuelingDQN forward.  x is NCHW float32 (raw 0..255 pixels)."""
    x = x_nchw.astype(jnp.float32)
    B, C, H, W = x.shape
    OH1, OW1 = _conv_out(H, 4, 2), _conv_out(W, 4, 2)
    OH2, OW2 = _conv_out(OH1, 5, 1), _conv_out(OW1, 5, 1)
    OH3, OW3 = _conv_out(OH2, 3, 1), _conv_out(OW2, 3, 1)
    assert min(OH1, OW1, OH2, OW2, OH3, OW3) >= 1, "input too small for convs"
    n1, n2, n3 = OH1 * OW1, OH2 * OW2, OH3 * OW3
    # pad position counts so 8*np is a multiple of 128 -> lane-aligned concats
    np1, np2, np3 = _round_up(n1, 16), _round_up(n2, 16), _round_up(n3, 16)

    A = params["w2a"].shape[1]
    hid = params["w2a"].shape[0]
    CHW = C * H * W

    # --- conv-as-FC weight expansion (tiny, layout only, done once under jit)
    w1 = _conv_fc_weight(params["w1"], H, W, 2, H * W, np1) * (1.0 / 255.0)
    b1 = _conv_fc_bias(params["b1"], n1, np1)
    w2 = _conv_fc_weight(params["w2"], OH1, OW1, 1, np1, np2)
    b2 = _conv_fc_bias(params["b2"], n2, np2)
    w3 = _conv_fc_weight(params["w3"], OH2, OW2, 1, np2, np3)
    b3 = _conv_fc_bias(params["b3"], n3, np3)

    # --- dueling head: batch first layers, fuse second layers (block-diagonal)
    w1av = jnp.concatenate([params["w1a"], params["w1v"]], axis=1)  # [16*n3, 2*hid]
    w1av = jnp.pad(w1av.reshape(16, n3, 2 * hid),
                   ((0, 0), (0, np3 - n3), (0, 0))).reshape(16 * np3, 2 * hid)
    b1av = jnp.concatenate([params["b1a"], params["b1v"]], axis=1)  # [1, 2*hid]
    w2av = jnp.zeros((2 * hid, A + 1), jnp.float32)
    w2av = w2av.at[:hid, :A].set(params["w2a"])
    w2av = w2av.at[hid:, A:].set(params["w2v"].T)
    b2av = jnp.concatenate([params["b2a"], params["b2v"]], axis=1)  # [1, A+1]

    # --- batch tiling: TB samples per grid step, padded batch
    TB = min(32, _round_up(B, 8))
    B_pad = _round_up(B, TB)
    x_flat = jnp.pad(x.reshape(B, CHW), ((0, B_pad - B), (0, 0)))  # NCHW flatten

    def const_spec(a):
        return pl.BlockSpec(a.shape, lambda i: (0,) * a.ndim)

    out = pl.pallas_call(
        _dueling_dqn_kernel,
        out_shape=jax.ShapeDtypeStruct((B_pad, A), jnp.float32),
        grid=(B_pad // TB,),
        in_specs=[
            pl.BlockSpec((TB, CHW), lambda i: (i, 0)),
            const_spec(w1), const_spec(b1),
            const_spec(w2), const_spec(b2),
            const_spec(w3), const_spec(b3),
            const_spec(w1av), const_spec(b1av),
            const_spec(w2av), const_spec(b2av),
        ],
        out_specs=pl.BlockSpec((TB, A), lambda i: (i, 0)),
        compiler_params=pltpu.CompilerParams(
            dimension_semantics=("parallel",)),
    )(x_flat, w1, b1, w2, b2, w3, b3, w1av, b1av, w2av, b2av)
    return out[:B]


# ----------------------------------------------------------------------------
# Pure-JAX reference (mirrors the PyTorch module) for correctness checking
# ----------------------------------------------------------------------------
def reference_forward(params, x_nchw):
    x = x_nchw.astype(jnp.float32) / 255.0
    prec = lax.Precision.HIGHEST

    def conv(x, w_hwio, b, stride):
        y = lax.conv_general_dilated(
            x, w_hwio, window_strides=(stride, stride), padding="VALID",
            dimension_numbers=("NCHW", "HWIO", "NCHW"), precision=prec)
        return y + b.reshape(1, -1, 1, 1)

    def crelu(y):
        return jnp.concatenate([jnp.maximum(y, 0.0), jnp.maximum(-y, 0.0)], axis=1)

    x = crelu(conv(x, params["w1"], params["b1"], 2))
    x = crelu(conv(x, params["w2"], params["b2"], 1))
    x = crelu(conv(x, params["w3"], params["b3"], 1))
    f = x.reshape(x.shape[0], -1)                                  # NCHW flatten

    adv = jnp.maximum(jnp.dot(f, params["w1a"], precision=prec) + params["b1a"], 0.0)
    adv = jnp.dot(adv, params["w2a"], precision=prec) + params["b2a"]
    val = jnp.maximum(jnp.dot(f, params["w1v"], precision=prec) + params["b1v"], 0.0)
    val = jnp.dot(val, params["w2v"].T, precision=prec) + params["b2v"]
    return val + adv - jnp.mean(adv, axis=1, keepdims=True)


# ----------------------------------------------------------------------------
# Deterministic parameter init (PyTorch-default-like uniform bounds)
# ----------------------------------------------------------------------------
def init_params(key, in_ch, num_actions, H, W):
    def u(k, shape, fan_in):
        bound = 1.0 / jnp.sqrt(jnp.float32(fan_in))
        return jax.random.uniform(k, shape, jnp.float32, -bound, bound)

    oh = _conv_out(_conv_out(_conv_out(H, 4, 2), 5, 1), 3, 1)
    ow = _conv_out(_conv_out(_conv_out(W, 4, 2), 5, 1), 3, 1)
    feat = 16 * oh * ow                                 # 2*8 channels after final cReLU

    ks = jax.random.split(key, 14)
    return {
        # conv weights stored HWIO (kh, kw, Cin, Cout); biases as [1, Cout]
        "w1": u(ks[0], (4, 4, in_ch, 8), in_ch * 16),
        "b1": u(ks[1], (1, 8), in_ch * 16),
        "w2": u(ks[2], (5, 5, 16, 8), 16 * 25),
        "b2": u(ks[3], (1, 8), 16 * 25),
        "w3": u(ks[4], (3, 3, 16, 8), 16 * 9),
        "b3": u(ks[5], (1, 8), 16 * 9),
        # advantage head (== self.fc)
        "w1a": u(ks[6], (feat, 32), feat),
        "b1a": u(ks[7], (1, 32), feat),
        "w2a": u(ks[8], (32, num_actions), 32),
        "b2a": u(ks[9], (1, num_actions), 32),
        # value head
        "w1v": u(ks[10], (feat, 32), feat),
        "b1v": u(ks[11], (1, 32), feat),
        "w2v": u(ks[12], (1, 32), 32),                  # PyTorch Linear(32,1).weight
        "b2v": u(ks[13], (1, 1), 32),
    }


if __name__ == "__main__":
    key = jax.random.PRNGKey(0)
    B, C, H, W = 2, 4, 16, 16       # small synthetic env: obs (4, 16, 16)
    NUM_ACTIONS = 6

    params = init_params(key, C, NUM_ACTIONS, H, W)
    x = jax.random.uniform(jax.random.fold_in(key, 123), (B, C, H, W),
                           jnp.float32, 0.0, 255.0)

    out = jax.jit(dueling_dqn_forward)(params, x)
    out = jax.block_until_ready(out)
    ref = reference_forward(params, x)

    assert out.shape == (B, NUM_ACTIONS), out.shape
    assert bool(jnp.all(jnp.isfinite(out)))
    assert bool(jnp.allclose(out, ref, rtol=1e-3, atol=1e-3)), (out, ref)
    print("KERNEL_OK")
</pallas_src>

<mosaic_0001>
module attributes {stable_mosaic.version = 11 : i64} {
  func.func @_dueling_dqn_kernel(%arg0: i32, %arg1: memref<8x1024xf32, #tpu.memory_space<vmem>>, %arg2: memref<1024x512xf32, #tpu.memory_space<vmem>>, %arg3: memref<1x512xf32, #tpu.memory_space<vmem>>, %arg4: memref<1024x128xf32, #tpu.memory_space<vmem>>, %arg5: memref<1x128xf32, #tpu.memory_space<vmem>>, %arg6: memref<256x128xf32, #tpu.memory_space<vmem>>, %arg7: memref<1x128xf32, #tpu.memory_space<vmem>>, %arg8: memref<256x64xf32, #tpu.memory_space<vmem>>, %arg9: memref<1x64xf32, #tpu.memory_space<vmem>>, %arg10: memref<64x7xf32, #tpu.memory_space<vmem>>, %arg11: memref<1x7xf32, #tpu.memory_space<vmem>>, %arg12: memref<8x6xf32, #tpu.memory_space<vmem>>) attributes {dimension_semantics = [#tpu.dimension_semantics<parallel>], iteration_bounds = array<i64: 1>, scalar_prefetch = 0 : i64, scratch_operands = 0 : i64, tpu.core_type = #tpu.core_type<tc>, window_params = [{transform_indices = @transform_0, window_bounds = array<i64: 8, 1024>}, {pipeline_mode = #tpu.pipeline_mode<synchronous>, transform_indices = @transform_1, window_bounds = array<i64: 1024, 512>}, {pipeline_mode = #tpu.pipeline_mode<synchronous>, transform_indices = @transform_2, window_bounds = array<i64: 1, 512>}, {pipeline_mode = #tpu.pipeline_mode<synchronous>, transform_indices = @transform_3, window_bounds = array<i64: 1024, 128>}, {pipeline_mode = #tpu.pipeline_mode<synchronous>, transform_indices = @transform_4, window_bounds = array<i64: 1, 128>}, {pipeline_mode = #tpu.pipeline_mode<synchronous>, transform_indices = @transform_5, window_bounds = array<i64: 256, 128>}, {pipeline_mode = #tpu.pipeline_mode<synchronous>, transform_indices = @transform_6, window_bounds = array<i64: 1, 128>}, {pipeline_mode = #tpu.pipeline_mode<synchronous>, transform_indices = @transform_7, window_bounds = array<i64: 256, 64>}, {pipeline_mode = #tpu.pipeline_mode<synchronous>, transform_indices = @transform_8, window_bounds = array<i64: 1, 64>}, {pipeline_mode = #tpu.pipeline_mode<synchronous>, transform_indices = @transform_9, window_bounds = array<i64: 64, 7>}, {pipeline_mode = #tpu.pipeline_mode<synchronous>, transform_indices = @transform_10, window_bounds = array<i64: 1, 7>}, {transform_indices = @transform_11, window_bounds = array<i64: 8, 6>}]} {
    %c0 = arith.constant 0 : index
    %c0_0 = arith.constant 0 : index
    %0 = vector.load %arg1[%c0, %c0_0] : memref<8x1024xf32, #tpu.memory_space<vmem>>, vector<8x1024xf32>
    %c0_1 = arith.constant 0 : index
    %c0_2 = arith.constant 0 : index
    %1 = vector.load %arg2[%c0_1, %c0_2] : memref<1024x512xf32, #tpu.memory_space<vmem>>, vector<1024x512xf32>
    %cst = arith.constant dense<0.000000e+00> : vector<8x512xf32>
    %2 = tpu.matmul %0, %1, %cst {dimension_numbers = #tpu.dot_dimension_numbers<[1], [0], [0], [1], [0, 0, 1, 1], [], []>} : vector<8x1024xf32>, vector<1024x512xf32>, vector<8x512xf32> -> vector<8x512xf32>
    %c0_3 = arith.constant 0 : index
    %c0_4 = arith.constant 0 : index
    %3 = vector.load %arg3[%c0_3, %c0_4] : memref<1x512xf32, #tpu.memory_space<vmem>>, vector<1x512xf32>
    %4 = vector.broadcast %3 : vector<1x512xf32> to vector<8x512xf32>
    %5 = arith.addf %2, %4 : vector<8x512xf32>
    %cst_5 = arith.constant 0.000000e+00 : f32
    %6 = vector.broadcast %cst_5 : f32 to vector<8x512xf32>
    %7 = arith.maximumf %5, %6 : vector<8x512xf32>
    %cst_6 = arith.constant 0.000000e+00 : f32
    %8 = vector.broadcast %cst_6 : f32 to vector<8x512xf32>
    %9 = arith.subf %8, %5 : vector<8x512xf32>
    %cst_7 = arith.constant 0.000000e+00 : f32
    %10 = vector.broadcast %cst_7 : f32 to vector<8x512xf32>
    %11 = arith.maximumf %9, %10 : vector<8x512xf32>
    %12 = tpu.concatenate %7, %11 in 1 : vector<8x512xf32>, vector<8x512xf32> -> vector<8x1024xf32>
    %c0_8 = arith.constant 0 : index
    %c0_9 = arith.constant 0 : index
    %13 = vector.load %arg4[%c0_8, %c0_9] : memref<1024x128xf32, #tpu.memory_space<vmem>>, vector<1024x128xf32>
    %cst_10 = arith.constant dense<0.000000e+00> : vector<8x128xf32>
    %14 = tpu.matmul %12, %13, %cst_10 {dimension_numbers = #tpu.dot_dimension_numbers<[1], [0], [0], [1], [0, 0, 1, 1], [], []>} : vector<8x1024xf32>, vector<1024x128xf32>, vector<8x128xf32> -> vector<8x128xf32>
    %c0_11 = arith.constant 0 : index
    %c0_12 = arith.constant 0 : index
    %15 = vector.load %arg5[%c0_11, %c0_12] : memref<1x128xf32, #tpu.memory_space<vmem>>, vector<1x128xf32>
    %16 = vector.broadcast %15 : vector<1x128xf32> to vector<8x128xf32>
    %17 = arith.addf %14, %16 : vector<8x128xf32>
    %cst_13 = arith.constant 0.000000e+00 : f32
    %18 = vector.broadcast %cst_13 : f32 to vector<8x128xf32>
    %19 = arith.maximumf %17, %18 : vector<8x128xf32>
    %cst_14 = arith.constant 0.000000e+00 : f32
    %20 = vector.broadcast %cst_14 : f32 to vector<8x128xf32>
    %21 = arith.subf %20, %17 : vector<8x128xf32>
    %cst_15 = arith.constant 0.000000e+00 : f32
    %22 = vector.broadcast %cst_15 : f32 to vector<8x128xf32>
    %23 = arith.maximumf %21, %22 : vector<8x128xf32>
    %24 = tpu.concatenate %19, %23 in 1 : vector<8x128xf32>, vector<8x128xf32> -> vector<8x256xf32>
    %c0_16 = arith.constant 0 : index
    %c0_17 = arith.constant 0 : index
    %25 = vector.load %arg6[%c0_16, %c0_17] : memref<256x128xf32, #tpu.memory_space<vmem>>, vector<256x128xf32>
    %cst_18 = arith.constant dense<0.000000e+00> : vector<8x128xf32>
    %26 = tpu.matmul %24, %25, %cst_18 {dimension_numbers = #tpu.dot_dimension_numbers<[1], [0], [0], [1], [0, 0, 1, 1], [], []>} : vector<8x256xf32>, vector<256x128xf32>, vector<8x128xf32> -> vector<8x128xf32>
    %c0_19 = arith.constant 0 : index
    %c0_20 = arith.constant 0 : index
    %27 = vector.load %arg7[%c0_19, %c0_20] : memref<1x128xf32, #tpu.memory_space<vmem>>, vector<1x128xf32>
    %28 = vector.broadcast %27 : vector<1x128xf32> to vector<8x128xf32>
    %29 = arith.addf %26, %28 : vector<8x128xf32>
    %cst_21 = arith.constant 0.000000e+00 : f32
    %30 = vector.broadcast %cst_21 : f32 to vector<8x128xf32>
    %31 = arith.maximumf %29, %30 : vector<8x128xf32>
    %cst_22 = arith.constant 0.000000e+00 : f32
    %32 = vector.broadcast %cst_22 : f32 to vector<8x128xf32>
    %33 = arith.subf %32, %29 : vector<8x128xf32>
    %cst_23 = arith.constant 0.000000e+00 : f32
    %34 = vector.broadcast %cst_23 : f32 to vector<8x128xf32>
    %35 = arith.maximumf %33, %34 : vector<8x128xf32>
    %36 = tpu.concatenate %31, %35 in 1 : vector<8x128xf32>, vector<8x128xf32> -> vector<8x256xf32>
    %c0_24 = arith.constant 0 : index
    %c0_25 = arith.constant 0 : index
    %37 = vector.load %arg8[%c0_24, %c0_25] : memref<256x64xf32, #tpu.memory_space<vmem>>, vector<256x64xf32>
    %cst_26 = arith.constant dense<0.000000e+00> : vector<8x64xf32>
    %38 = tpu.matmul %36, %37, %cst_26 {dimension_numbers = #tpu.dot_dimension_numbers<[1], [0], [0], [1], [0, 0, 1, 1], [], []>} : vector<8x256xf32>, vector<256x64xf32>, vector<8x64xf32> -> vector<8x64xf32>
    %c0_27 = arith.constant 0 : index
    %c0_28 = arith.constant 0 : index
    %39 = vector.load %arg9[%c0_27, %c0_28] : memref<1x64xf32, #tpu.memory_space<vmem>>, vector<1x64xf32>
    %40 = vector.broadcast %39 : vector<1x64xf32> to vector<8x64xf32>
    %41 = arith.addf %38, %40 : vector<8x64xf32>
    %cst_29 = arith.constant 0.000000e+00 : f32
    %42 = vector.broadcast %cst_29 : f32 to vector<8x64xf32>
    %43 = arith.maximumf %41, %42 : vector<8x64xf32>
    %c0_30 = arith.constant 0 : index
    %c0_31 = arith.constant 0 : index
    %44 = vector.load %arg10[%c0_30, %c0_31] : memref<64x7xf32, #tpu.memory_space<vmem>>, vector<64x7xf32>
    %cst_32 = arith.constant dense<0.000000e+00> : vector<8x7xf32>
    %45 = tpu.matmul %43, %44, %cst_32 {dimension_numbers = #tpu.dot_dimension_numbers<[1], [0], [0], [1], [0, 0, 1, 1], [], []>} : vector<8x64xf32>, vector<64x7xf32>, vector<8x7xf32> -> vector<8x7xf32>
    %c0_33 = arith.constant 0 : index
    %c0_34 = arith.constant 0 : index
    %46 = vector.load %arg11[%c0_33, %c0_34] : memref<1x7xf32, #tpu.memory_space<vmem>>, vector<1x7xf32>
    %47 = vector.broadcast %46 : vector<1x7xf32> to vector<8x7xf32>
    %48 = arith.addf %45, %47 : vector<8x7xf32>
    %49 = vector.extract_strided_slice %48 {offsets = [0, 0], sizes = [8, 6], strides = [1, 1]} : vector<8x7xf32> to vector<8x6xf32>
    %50 = vector.extract_strided_slice %48 {offsets = [0, 6], sizes = [8, 1], strides = [1, 1]} : vector<8x7xf32> to vector<8x1xf32>
    %51 = vector.broadcast %50 : vector<8x1xf32> to vector<8x6xf32>
    %52 = arith.addf %51, %49 : vector<8x6xf32>
    %cst_35 = arith.constant dense<0.000000e+00> : vector<8xf32>
    %53 = vector.multi_reduction <add>, %49, %cst_35 [1] : vector<8x6xf32> to vector<8xf32>
    %54 = vector.shape_cast %53 : vector<8xf32> to vector<8x1xf32>
    %cst_36 = arith.constant 6.000000e+00 : f32
    %55 = vector.broadcast %cst_36 : f32 to vector<8x1xf32>
    %56 = arith.divf %54, %55 : vector<8x1xf32>
    %57 = vector.broadcast %56 : vector<8x1xf32> to vector<8x6xf32>
    %58 = arith.subf %52, %57 : vector<8x6xf32>
    %c0_37 = arith.constant 0 : index
    %c0_38 = arith.constant 0 : index
    %59 = vector.load %arg12[%c0_37, %c0_38] : memref<8x6xf32, #tpu.memory_space<vmem>>, vector<8x6xf32>
    tpu.vector_store %arg12[%c0_37, %c0_38], %58 {strides = array<i32>} : memref<8x6xf32, #tpu.memory_space<vmem>>, vector<8x6xf32>,
    return
  }
  func.func @transform_0(%arg0: i32) -> (i32, i32) {
    %c0_i32 = arith.constant 0 : i32
    %c0_i32_0 = arith.constant 0 : i32
    return %arg0, %c0_i32 : i32, i32
  }
  func.func @transform_1(%arg0: i32) -> (i32, i32) {
    %c0_i32 = arith.constant 0 : i32
    %c0_i32_0 = arith.constant 0 : i32
    %c0_i32_1 = arith.constant 0 : i32
    return %c0_i32, %c0_i32_0 : i32, i32
  }
  func.func @transform_2(%arg0: i32) -> (i32, i32) {
    %c0_i32 = arith.constant 0 : i32
    %c0_i32_0 = arith.constant 0 : i32
    %c0_i32_1 = arith.constant 0 : i32
    return %c0_i32, %c0_i32_0 : i32, i32
  }
  func.func @transform_3(%arg0: i32) -> (i32, i32) {
    %c0_i32 = arith.constant 0 : i32
    %c0_i32_0 = arith.constant 0 : i32
    %c0_i32_1 = arith.constant 0 : i32
    return %c0_i32, %c0_i32_0 : i32, i32
  }
  func.func @transform_4(%arg0: i32) -> (i32, i32) {
    %c0_i32 = arith.constant 0 : i32
    %c0_i32_0 = arith.constant 0 : i32
    %c0_i32_1 = arith.constant 0 : i32
    return %c0_i32, %c0_i32_0 : i32, i32
  }
  func.func @transform_5(%arg0: i32) -> (i32, i32) {
    %c0_i32 = arith.constant 0 : i32
    %c0_i32_0 = arith.constant 0 : i32
    %c0_i32_1 = arith.constant 0 : i32
    return %c0_i32, %c0_i32_0 : i32, i32
  }
  func.func @transform_6(%arg0: i32) -> (i32, i32) {
    %c0_i32 = arith.constant 0 : i32
    %c0_i32_0 = arith.constant 0 : i32
    %c0_i32_1 = arith.constant 0 : i32
    return %c0_i32, %c0_i32_0 : i32, i32
  }
  func.func @transform_7(%arg0: i32) -> (i32, i32) {
    %c0_i32 = arith.constant 0 : i32
    %c0_i32_0 = arith.constant 0 : i32
    %c0_i32_1 = arith.constant 0 : i32
    return %c0_i32, %c0_i32_0 : i32, i32
  }
  func.func @transform_8(%arg0: i32) -> (i32, i32) {
    %c0_i32 = arith.constant 0 : i32
    %c0_i32_0 = arith.constant 0 : i32
    %c0_i32_1 = arith.constant 0 : i32
    return %c0_i32, %c0_i32_0 : i32, i32
  }
  func.func @transform_9(%arg0: i32) -> (i32, i32) {
    %c0_i32 = arith.constant 0 : i32
    %c0_i32_0 = arith.constant 0 : i32
    %c0_i32_1 = arith.constant 0 : i32
    return %c0_i32, %c0_i32_0 : i32, i32
  }
  func.func @transform_10(%arg0: i32) -> (i32, i32) {
    %c0_i32 = arith.constant 0 : i32
    %c0_i32_0 = arith.constant 0 : i32
    %c0_i32_1 = arith.constant 0 : i32
    return %c0_i32, %c0_i32_0 : i32, i32
  }
  func.func @transform_11(%arg0: i32) -> (i32, i32) {
    %c0_i32 = arith.constant 0 : i32
    %c0_i32_0 = arith.constant 0 : i32
    return %arg0, %c0_i32 : i32, i32
  }
}

</mosaic_0001>

<bundles_post_ra>
// kernel: dueling_dqn_forward.1
= control target key start
LH: loop header
LB: loop body
LE: loop exit
PB: predicated region body
PF: predicated region fallthrough
CT: control target
= control target key end

     0   :  { %vm2888_vm0 = vmmov 0   ;;  %vm1815_vm1 = vcmask 523264   ;;  %vm1895_vm2 = vcmask 48128   ;;  %s5137_s1 = inlined_call_operand.vmem [shape: f32[1024,512], index: 1, kind: input, shape index: {}]   ;;  %s5138_s0 = inlined_call_operand.vmem [shape: f32[8,1024], index: 0, kind: input, shape index: {}]   ;;  %s5139_s3 = inlined_call_operand.vmem [shape: f32[1024,128], index: 3, kind: input, shape index: {}]   ;;  %s5140_s2 = inlined_call_operand.vmem [shape: f32[1,512], index: 2, kind: input, shape index: {}]   ;;  %s5141_s5 = inlined_call_operand.vmem [shape: f32[256,128], index: 5, kind: input, shape index: {}]   ;;  %s5142_s7 = inlined_call_operand.vmem [shape: f32[256,64], index: 7, kind: input, shape index: {}]   ;;  %s5143_s4 = inlined_call_operand.vmem [shape: f32[1,128], index: 4, kind: input, shape index: {}]   ;;  %s5144_s9 = inlined_call_operand.vmem [shape: f32[64,7], index: 9, kind: input, shape index: {}]   ;;  %s5145_s6 = inlined_call_operand.vmem [shape: f32[1,128], index: 6, kind: input, shape index: {}]   ;;  %s5146_s8 = inlined_call_operand.vmem [shape: f32[1,64], index: 8, kind: input, shape index: {}]   ;;  %s5147_s10 = inlined_call_operand.vmem [shape: f32[1,7], index: 10, kind: input, shape index: {}]   ;;  %s5148_s11 = inlined_call_operand.vmem [shape: f32[8,6], index: 11, kind: output, shape index: {}]  }
   0x1   :  { %v47_v0 = vld [vmem:[%s5137_s1 + $0x8] sm:$0xff]  ;;  %v49_v2 = vld [vmem:[%s5137_s1 + $0x18] sm:$0xff]  ;;  %v46_v5 = vld [vmem:[%s5137_s1] sm:$0xff] }
   0x2   :  { %v51_v1 = vld [vmem:[%s5137_s1 + $0x28] sm:$0xff]  ;;  %v53_v4 = vld [vmem:[%s5137_s1 + $0x38] sm:$0xff]  ;;  %v50_v6 = vld [vmem:[%s5137_s1 + $0x20] sm:$0xff] }
   0x3   :  { %v2150_v3 = vpack.c.bf16 %v51_v1, %v47_v0  ;;  %v2406_v7 = vpack.c.bf16 %v53_v4, %v49_v2  ;;  %v2152_v8 = vpack.c.bf16 %v50_v6, %v46_v5  ;;  %v48_v9 = vld [vmem:[%s5137_s1 + $0x10] sm:$0xff]  ;;  %v55_v11 = vld [vmem:[%s5137_s1 + $0x48] sm:$0xff]  ;;  %v57_v14 = vld [vmem:[%s5137_s1 + $0x58] sm:$0xff] }
   0x4   :  { %v52_v10 = vld [vmem:[%s5137_s1 + $0x30] sm:$0xff]  ;;  %v59_v13 = vld [vmem:[%s5137_s1 + $0x68] sm:$0xff]  ;;  %v61_v15 = vld [vmem:[%s5137_s1 + $0x78] sm:$0xff] }
   0x5   :  { %2151 = vmatprep.subr.bf16.mxu0 %v2150_v3  ;;  %v2408_v12 = vpack.c.bf16 %v52_v10, %v48_v9  ;;  %2407 = vmatprep.subr.bf16.mxu1 %v2406_v7  ;;  %v2154_v16 = vpack.c.bf16 %v59_v13, %v55_v11  ;;  %v2410_v17 = vpack.c.bf16 %v61_v15, %v57_v14  ;;  %v54_v18 = vld [vmem:[%s5137_s1 + $0x40] sm:$0xff]  ;;  %v56_v20 = vld [vmem:[%s5137_s1 + $0x50] sm:$0xff]  ;;  %v63_v23 = vld [vmem:[%s5137_s1 + $0x88] sm:$0xff] }
   0x6   :  { %2153 = vmatpush1.bf16.msra.mxu0 %v2152_v8  ;;  %v58_v19 = vld [vmem:[%s5137_s1 + $0x60] sm:$0xff]  ;;  %v60_v22 = vld [vmem:[%s5137_s1 + $0x70] sm:$0xff]  ;;  %v67_v24 = vld [vmem:[%s5137_s1 + $0xa8] sm:$0xff] }
   0x7   :  { %2409 = vmatpush1.bf16.msra.mxu1 %v2408_v12  ;;  %v2156_v21 = vpack.c.bf16 %v58_v19, %v54_v18  ;;  %2155 = vmatprep.subr.bf16.mxu0 %v2154_v16  ;;  %v2412_v25 = vpack.c.bf16 %v60_v22, %v56_v20  ;;  %v2158_v26 = vpack.c.bf16 %v67_v24, %v63_v23  ;;  %v65_v27 = vld [vmem:[%s5137_s1 + $0x98] sm:$0xff]  ;;  %v62_v29 = vld [vmem:[%s5137_s1 + $0x80] sm:$0xff]  ;;  %v64_v32 = vld [vmem:[%s5137_s1 + $0x90] sm:$0xff] }
   0x8   :  { %2411 = vmatprep.subr.bf16.mxu1 %v2410_v17  ;;  %v69_v28 = vld [vmem:[%s5137_s1 + $0xb8] sm:$0xff]  ;;  %v66_v31 = vld [vmem:[%s5137_s1 + $0xa0] sm:$0xff]  ;;  %v68_v33 = vld [vmem:[%s5137_s1 + $0xb0] sm:$0xff] }
   0x9   :  { %v2414_v30 = vpack.c.bf16 %v69_v28, %v65_v27  ;;  %v2160_v34 = vpack.c.bf16 %v66_v31, %v62_v29  ;;  %v71_v35 = vld [vmem:[%s5137_s1 + $0xc8] sm:$0xff]  ;;  %v73_v37 = vld [vmem:[%s5137_s1 + $0xd8] sm:$0xff]  ;;  %v2416_v38 = vpack.c.bf16 %v68_v33, %v64_v32  ;;  %v70_v41 = vld [vmem:[%s5137_s1 + $0xc0] sm:$0xff] }
   0xa   :  { %2157 = vmatpush1.bf16.msra.mxu0 %v2156_v21  ;;  %v75_v36 = vld [vmem:[%s5137_s1 + $0xe8] sm:$0xff]  ;;  %v77_v40 = vld [vmem:[%s5137_s1 + $0xf8] sm:$0xff]  ;;  %v74_v42 = vld [vmem:[%s5137_s1 + $0xe0] sm:$0xff] }
   0xb   :  { %2413 = vmatpush1.bf16.msra.mxu1 %v2412_v25  ;;  %2159 = vmatprep.subr.bf16.mxu0 %v2158_v26  ;;  %v2162_v39 = vpack.c.bf16 %v75_v36, %v71_v35  ;;  %v2418_v43 = vpack.c.bf16 %v77_v40, %v73_v37  ;;  %v72_v44 = vld [vmem:[%s5137_s1 + $0xd0] sm:$0xff]  ;;  %v79_v46 = vld [vmem:[%s5137_s1 + $0x108] sm:$0xff]  ;;  %v81_v48 = vld [vmem:[%s5137_s1 + $0x118] sm:$0xff]  ;;  %v2164_v50 = vpack.c.bf16 %v74_v42, %v70_v41 }
   0xc   :  { %2415 = vmatprep.subr.bf16.mxu1 %v2414_v30  ;;  %v76_v45 = vld [vmem:[%s5137_s1 + $0xf0] sm:$0xff]  ;;  %v83_v47 = vld [vmem:[%s5137_s1 + $0x128] sm:$0xff]  ;;  %v85_v49 = vld [vmem:[%s5137_s1 + $0x138] sm:$0xff] }
   0xd   :  { %v2420_v51 = vpack.c.bf16 %v76_v45, %v72_v44  ;;  %v2166_v52 = vpack.c.bf16 %v83_v47, %v79_v46  ;;  %v78_v53 = vld [vmem:[%s5137_s1 + $0x100] sm:$0xff]  ;;  %v80_v55 = vld [vmem:[%s5137_s1 + $0x110] sm:$0xff]  ;;  %v2422_v56 = vpack.c.bf16 %v85_v49, %v81_v48  ;;  %v87_v58 = vld [vmem:[%s5137_s1 + $0x148] sm:$0xff] }
   0xe   :  { %2161 = vmatpush1.bf16.msra.mxu0 %v2160_v34  ;;  %v82_v54 = vld [vmem:[%s5137_s1 + $0x120] sm:$0xff]  ;;  %v84_v57 = vld [vmem:[%s5137_s1 + $0x130] sm:$0xff]  ;;  %v91_v59 = vld [vmem:[%s5137_s1 + $0x168] sm:$0xff] }
   0xf   :  { %2417 = vmatpush1.bf16.msra.mxu1 %v2416_v38  ;;  %2163 = vmatprep.subr.bf16.mxu0 %v2162_v39  ;;  %v89_v60 = vld [vmem:[%s5137_s1 + $0x158] sm:$0xff]  ;;  %v2168_v62 = vpack.c.bf16 %v82_v54, %v78_v53  ;;  %v2424_v63 = vpack.c.bf16 %v84_v57, %v80_v55  ;;  %v2170_v0 = vpack.c.bf16 %v91_v59, %v87_v58  ;;  %v86_v1 = vld [vmem:[%s5137_s1 + $0x140] sm:$0xff]  ;;  %v88_v3 = vld [vmem:[%s5137_s1 + $0x150] sm:$0xff] }
  0x10   :  { %2419 = vmatprep.subr.bf16.mxu1 %v2418_v43  ;;  %v93_v61 = vld [vmem:[%s5137_s1 + $0x178] sm:$0xff]  ;;  %v90_v2 = vld [vmem:[%s5137_s1 + $0x160] sm:$0xff]  ;;  %v92_v5 = vld [vmem:[%s5137_s1 + $0x170] sm:$0xff] }
  0x11   :  { %v2426_v4 = vpack.c.bf16 %v93_v61, %v89_v60  ;;  %v95_v6 = vld [vmem:[%s5137_s1 + $0x188] sm:$0xff]  ;;  %v97_v8 = vld [vmem:[%s5137_s1 + $0x198] sm:$0xff]  ;;  %v2172_v10 = vpack.c.bf16 %v90_v2, %v86_v1  ;;  %v2428_v11 = vpack.c.bf16 %v92_v5, %v88_v3  ;;  %v94_v13 = vld [vmem:[%s5137_s1 + $0x180] sm:$0xff] }
  0x12   :  { %2165 = vmatpush1.bf16.msra.mxu0 %v2164_v50  ;;  %v99_v7 = vld [vmem:[%s5137_s1 + $0x1a8] sm:$0xff]  ;;  %v101_v9 = vld [vmem:[%s5137_s1 + $0x1b8] sm:$0xff]  ;;  %v98_v14 = vld [vmem:[%s5137_s1 + $0x1a0] sm:$0xff] }
  0x13   :  { %2421 = vmatpush1.bf16.msra.mxu1 %v2420_v51  ;;  %2167 = vmatprep.subr.bf16.mxu0 %v2166_v52  ;;  %v2174_v12 = vpack.c.bf16 %v99_v7, %v95_v6  ;;  %v96_v15 = vld [vmem:[%s5137_s1 + $0x190] sm:$0xff]  ;;  %v2430_v16 = vpack.c.bf16 %v101_v9, %v97_v8  ;;  %v103_v18 = vld [vmem:[%s5137_s1 + $0x1c8] sm:$0xff]  ;;  %v105_v20 = vld [vmem:[%s5137_s1 + $0x1d8] sm:$0xff]  ;;  %v2176_v22 = vpack.c.bf16 %v98_v14, %v94_v13 }
  0x14   :  { %2423 = vmatprep.subr.bf16.mxu1 %v2422_v56  ;;  %v100_v17 = vld [vmem:[%s5137_s1 + $0x1b0] sm:$0xff]  ;;  %v107_v19 = vld [vmem:[%s5137_s1 + $0x1e8] sm:$0xff]  ;;  %v109_v21 = vld [vmem:[%s5137_s1 + $0x1f8] sm:$0xff] }
  0x15   :  { %v2432_v23 = vpack.c.bf16 %v100_v17, %v96_v15  ;;  %v2178_v24 = vpack.c.bf16 %v107_v19, %v103_v18  ;;  %v102_v25 = vld [vmem:[%s5137_s1 + $0x1c0] sm:$0xff]  ;;  %v104_v27 = vld [vmem:[%s5137_s1 + $0x1d0] sm:$0xff]  ;;  %v2434_v28 = vpack.c.bf16 %v109_v21, %v105_v20  ;;  %v111_v30 = vld [vmem:[%s5137_s1 + $0x208] sm:$0xff] }
  0x16   :  { %2169 = vmatpush1.bf16.msra.mxu0 %v2168_v62  ;;  %v106_v26 = vld [vmem:[%s5137_s1 + $0x1e0] sm:$0xff]  ;;  %v108_v29 = vld [vmem:[%s5137_s1 + $0x1f0] sm:$0xff]  ;;  %v115_v31 = vld [vmem:[%s5137_s1 + $0x228] sm:$0xff] }
  0x17   :  { %2425 = vmatpush1.bf16.msra.mxu1 %v2424_v63  ;;  %2171 = vmatprep.subr.bf16.mxu0 %v2170_v0  ;;  %v113_v32 = vld [vmem:[%s5137_s1 + $0x218] sm:$0xff]  ;;  %v2180_v34 = vpack.c.bf16 %v106_v26, %v102_v25  ;;  %v2436_v35 = vpack.c.bf16 %v108_v29, %v104_v27  ;;  %v2182_v36 = vpack.c.bf16 %v115_v31, %v111_v30  ;;  %v110_v37 = vld [vmem:[%s5137_s1 + $0x200] sm:$0xff]  ;;  %v112_v39 = vld [vmem:[%s5137_s1 + $0x210] sm:$0xff] }
  0x18   :  { %2427 = vmatprep.subr.bf16.mxu1 %v2426_v4  ;;  %v117_v33 = vld [vmem:[%s5137_s1 + $0x238] sm:$0xff]  ;;  %v114_v38 = vld [vmem:[%s5137_s1 + $0x220] sm:$0xff]  ;;  %v116_v41 = vld [vmem:[%s5137_s1 + $0x230] sm:$0xff] }
  0x19   :  { %v2438_v40 = vpack.c.bf16 %v117_v33, %v113_v32  ;;  %v119_v42 = vld [vmem:[%s5137_s1 + $0x248] sm:$0xff]  ;;  %v121_v44 = vld [vmem:[%s5137_s1 + $0x258] sm:$0xff]  ;;  %v2184_v46 = vpack.c.bf16 %v114_v38, %v110_v37  ;;  %v2440_v47 = vpack.c.bf16 %v116_v41, %v112_v39  ;;  %v118_v49 = vld [vmem:[%s5137_s1 + $0x240] sm:$0xff] }
  0x1a   :  { %2173 = vmatpush1.bf16.msra.mxu0 %v2172_v10  ;;  %v123_v43 = vld [vmem:[%s5137_s1 + $0x268] sm:$0xff]  ;;  %v125_v45 = vld [vmem:[%s5137_s1 + $0x278] sm:$0xff]  ;;  %v122_v50 = vld [vmem:[%s5137_s1 + $0x260] sm:$0xff] }
  0x1b   :  { %2429 = vmatpush1.bf16.msra.mxu1 %v2428_v11  ;;  %2175 = vmatprep.subr.bf16.mxu0 %v2174_v12  ;;  %v2186_v48 = vpack.c.bf16 %v123_v43, %v119_v42  ;;  %v120_v51 = vld [vmem:[%s5137_s1 + $0x250] sm:$0xff]  ;;  %v2442_v52 = vpack.c.bf16 %v125_v45, %v121_v44  ;;  %v127_v54 = vld [vmem:[%s5137_s1 + $0x288] sm:$0xff]  ;;  %v129_v56 = vld [vmem:[%s5137_s1 + $0x298] sm:$0xff]  ;;  %v2188_v58 = vpack.c.bf16 %v122_v50, %v118_v49 }
  0x1c   :  { %2431 = vmatprep.subr.bf16.mxu1 %v2430_v16  ;;  %v124_v53 = vld [vmem:[%s5137_s1 + $0x270] sm:$0xff]  ;;  %v131_v55 = vld [vmem:[%s5137_s1 + $0x2a8] sm:$0xff]  ;;  %v133_v57 = vld [vmem:[%s5137_s1 + $0x2b8] sm:$0xff] }
  0x1d   :  { %v2444_v59 = vpack.c.bf16 %v124_v53, %v120_v51  ;;  %v2190_v60 = vpack.c.bf16 %v131_v55, %v127_v54  ;;  %v126_v61 = vld [vmem:[%s5137_s1 + $0x280] sm:$0xff]  ;;  %v128_v63 = vld [vmem:[%s5137_s1 + $0x290] sm:$0xff]  ;;  %v2446_v0 = vpack.c.bf16 %v133_v57, %v129_v56  ;;  %v135_v2 = vld [vmem:[%s5137_s1 + $0x2c8] sm:$0xff] }
  0x1e   :  { %2177 = vmatpush1.bf16.msra.mxu0 %v2176_v22  ;;  %v130_v62 = vld [vmem:[%s5137_s1 + $0x2a0] sm:$0xff]  ;;  %v132_v1 = vld [vmem:[%s5137_s1 + $0x2b0] sm:$0xff]  ;;  %v139_v3 = vld [vmem:[%s5137_s1 + $0x2e8] sm:$0xff] }
  0x1f   :  { %2433 = vmatpush1.bf16.msra.mxu1 %v2432_v23  ;;  %2179 = vmatprep.subr.bf16.mxu0 %v2178_v24  ;;  %v137_v4 = vld [vmem:[%s5137_s1 + $0x2d8] sm:$0xff]  ;;  %v2192_v6 = vpack.c.bf16 %v130_v62, %v126_v61  ;;  %v134_v7 = vld [vmem:[%s5137_s1 + $0x2c0] sm:$0xff]  ;;  %v2448_v8 = vpack.c.bf16 %v132_v1, %v128_v63  ;;  %v2194_v9 = vpack.c.bf16 %v139_v3, %v135_v2  ;;  %v136_v11 = vld [vmem:[%s5137_s1 + $0x2d0] sm:$0xff] }
  0x20   :  { %2435 = vmatprep.subr.bf16.mxu1 %v2434_v28  ;;  %v141_v5 = vld [vmem:[%s5137_s1 + $0x2f8] sm:$0xff]  ;;  %v138_v10 = vld [vmem:[%s5137_s1 + $0x2e0] sm:$0xff]  ;;  %v140_v12 = vld [vmem:[%s5137_s1 + $0x2f0] sm:$0xff] }
  0x21   :  { %v2450_v13 = vpack.c.bf16 %v141_v5, %v137_v4  ;;  %v143_v14 = vld [vmem:[%s5137_s1 + $0x308] sm:$0xff]  ;;  %v145_v17 = vld [vmem:[%s5137_s1 + $0x318] sm:$0xff]  ;;  %v2196_v19 = vpack.c.bf16 %v138_v10, %v134_v7  ;;  %v2452_v20 = vpack.c.bf16 %v140_v12, %v136_v11  ;;  %v142_v22 = vld [vmem:[%s5137_s1 + $0x300] sm:$0xff] }
  0x22   :  { %2181 = vmatpush1.bf16.msra.mxu0 %v2180_v34  ;;  %v147_v15 = vld [vmem:[%s5137_s1 + $0x328] sm:$0xff]  ;;  %v149_v18 = vld [vmem:[%s5137_s1 + $0x338] sm:$0xff]  ;;  %v146_v23 = vld [vmem:[%s5137_s1 + $0x320] sm:$0xff] }
  0x23   :  { %2437 = vmatpush1.bf16.msra.mxu1 %v2436_v35  ;;  %2183 = vmatprep.subr.bf16.mxu0 %v2182_v36  ;;  %v39_v16 = vld [vmem:[%s5138_s0 + $0x8] sm:$0xff]  ;;  %v2198_v21 = vpack.c.bf16 %v147_v15, %v143_v14  ;;  %v144_v24 = vld [vmem:[%s5137_s1 + $0x310] sm:$0xff]  ;;  %v2454_v25 = vpack.c.bf16 %v149_v18, %v145_v17  ;;  %v153_v29 = vld [vmem:[%s5137_s1 + $0x358] sm:$0xff]  ;;  %v2200_v31 = vpack.c.bf16 %v146_v23, %v142_v22 }
  0x24   :  { %2439 = vmatprep.subr.bf16.mxu1 %v2438_v40  ;;  %644 = vmatprep.mubr.f32.mxu0 %v39_v16  ;;  %v148_v26 = vld [vmem:[%s5137_s1 + $0x330] sm:$0xff]  ;;  %v151_v27 = vld [vmem:[%s5137_s1 + $0x348] sm:$0xff]  ;;  %v157_v30 = vld [vmem:[%s5137_s1 + $0x378] sm:$0xff] }
  0x25   :  { %928 = vmatprep.mubr.f32.mxu1 %v39_v16  ;;  %v155_v28 = vld [vmem:[%s5137_s1 + $0x368] sm:$0xff]  ;;  %v2456_v32 = vpack.c.bf16 %v148_v26, %v144_v24  ;;  %v150_v34 = vld [vmem:[%s5137_s1 + $0x340] sm:$0xff]  ;;  %v152_v36 = vld [vmem:[%s5137_s1 + $0x350] sm:$0xff]  ;;  %v2458_v37 = vpack.c.bf16 %v157_v30, %v153_v29 }
  0x26   :  { %2185 = vmatpush1.bf16.msra.mxu0 %v2184_v46  ;;  %v2202_v33 = vpack.c.bf16 %v155_v28, %v151_v27  ;;  %v154_v35 = vld [vmem:[%s5137_s1 + $0x360] sm:$0xff]  ;;  %v156_v38 = vld [vmem:[%s5137_s1 + $0x370] sm:$0xff]  ;;  %v159_v39 = vld [vmem:[%s5137_s1 + $0x388] sm:$0xff] }
  0x27   :  { %2441 = vmatpush1.bf16.msra.mxu1 %v2440_v47  ;;  %2187 = vmatprep.subr.bf16.mxu0 %v2186_v48  ;;  %v163_v40 = vld [vmem:[%s5137_s1 + $0x3a8] sm:$0xff]  ;;  %v161_v41 = vld [vmem:[%s5137_s1 + $0x398] sm:$0xff]  ;;  %v2204_v43 = vpack.c.bf16 %v154_v35, %v150_v34  ;;  %v2460_v44 = vpack.c.bf16 %v156_v38, %v152_v36  ;;  %v158_v46 = vld [vmem:[%s5137_s1 + $0x380] sm:$0xff] }
  0x28   :  { %2443 = vmatprep.subr.bf16.mxu1 %v2442_v52  ;;  %v165_v42 = vld [vmem:[%s5137_s1 + $0x3b8] sm:$0xff]  ;;  %v2206_v45 = vpack.c.bf16 %v163_v40, %v159_v39  ;;  %v162_v47 = vld [vmem:[%s5137_s1 + $0x3a0] sm:$0xff]  ;;  %v160_v48 = vld [vmem:[%s5137_s1 + $0x390] sm:$0xff] }
  0x29   :  { %v2462_v49 = vpack.c.bf16 %v165_v42, %v161_v41  ;;  %v164_v50 = vld [vmem:[%s5137_s1 + $0x3b0] sm:$0xff]  ;;  %v167_v51 = vld [vmem:[%s5137_s1 + $0x3c8] sm:$0xff]  ;;  %v169_v53 = vld [vmem:[%s5137_s1 + $0x3d8] sm:$0xff]  ;;  %v2208_v55 = vpack.c.bf16 %v162_v47, %v158_v46 }
  0x2a   :  { %2189 = vmatpush1.bf16.msra.mxu0 %v2188_v58  ;;  %v171_v52 = vld [vmem:[%s5137_s1 + $0x3e8] sm:$0xff]  ;;  %v173_v54 = vld [vmem:[%s5137_s1 + $0x3f8] sm:$0xff]  ;;  %v2464_v56 = vpack.c.bf16 %v164_v50, %v160_v48  ;;  %v166_v58 = vld [vmem:[%s5137_s1 + $0x3c0] sm:$0xff] }
  0x2b   :  { %2445 = vmatpush1.bf16.msra.mxu1 %v2444_v59  ;;  %2191 = vmatprep.subr.bf16.mxu0 %v2190_v60  ;;  %v2210_v57 = vpack.c.bf16 %v171_v52, %v167_v51  ;;  %v170_v59 = vld [vmem:[%s5137_s1 + $0x3e0] sm:$0xff]  ;;  %v168_v60 = vld [vmem:[%s5137_s1 + $0x3d0] sm:$0xff]  ;;  %v2466_v61 = vpack.c.bf16 %v173_v54, %v169_v53  ;;  %v175_v63 = vld [vmem:[%s5137_s1 + $0x408] sm:$0xff] }
  0x2c   :  { %2447 = vmatprep.subr.bf16.mxu1 %v2446_v0  ;;  %v172_v62 = vld [vmem:[%s5137_s1 + $0x3f0] sm:$0xff]  ;;  %v179_v0 = vld [vmem:[%s5137_s1 + $0x428] sm:$0xff]  ;;  %v177_v1 = vld [vmem:[%s5137_s1 + $0x418] sm:$0xff]  ;;  %v2212_v3 = vpack.c.bf16 %v170_v59, %v166_v58 }
  0x2d   :  { %v181_v2 = vld [vmem:[%s5137_s1 + $0x438] sm:$0xff]  ;;  %v2468_v4 = vpack.c.bf16 %v172_v62, %v168_v60  ;;  %v2214_v5 = vpack.c.bf16 %v179_v0, %v175_v63  ;;  %v178_v7 = vld [vmem:[%s5137_s1 + $0x420] sm:$0xff]  ;;  %v180_v10 = vld [vmem:[%s5137_s1 + $0x430] sm:$0xff] }
  0x2e   :  { %2193 = vmatpush1.bf16.msra.mxu0 %v2192_v6  ;;  %v174_v6 = vld [vmem:[%s5137_s1 + $0x400] sm:$0xff]  ;;  %v183_v11 = vld [vmem:[%s5137_s1 + $0x448] sm:$0xff]  ;;  %v189_v14 = vld [vmem:[%s5137_s1 + $0x478] sm:$0xff] }
  0x2f   :  { %2449 = vmatpush1.bf16.msra.mxu1 %v2448_v8  ;;  %2195 = vmatprep.subr.bf16.mxu0 %v2194_v9  ;;  %v176_v8 = vld [vmem:[%s5137_s1 + $0x410] sm:$0xff]  ;;  %v2470_v9 = vpack.c.bf16 %v181_v2, %v177_v1  ;;  %v187_v12 = vld [vmem:[%s5137_s1 + $0x468] sm:$0xff]  ;;  %v38_v15 = vld [vmem:[%s5138_s0] sm:$0xff]  ;;  %v2216_v16 = vpack.c.bf16 %v178_v7, %v174_v6 }
  0x30   :  { %2451 = vmatprep.subr.bf16.mxu1 %v2450_v13  ;;  %v185_v13 = vld [vmem:[%s5137_s1 + $0x458] sm:$0xff]  ;;  %v2472_v17 = vpack.c.bf16 %v180_v10, %v176_v8  ;;  %v2218_v18 = vpack.c.bf16 %v187_v12, %v183_v11  ;;  %v188_v23 = vld [vmem:[%s5137_s1 + $0x470] sm:$0xff]  ;;  %v191_v24 = vld [vmem:[%s5137_s1 + $0x488] sm:$0xff] }
  0x31   :  { %v2474_v22 = vpack.c.bf16 %v189_v14, %v185_v13  ;;  %v193_v26 = vld [vmem:[%s5137_s1 + $0x498] sm:$0xff]  ;;  %v196_v35 = vld [vmem:[%s5137_s1 + $0x4b0] sm:$0xff]  ;;  %v199_v36 = vld [vmem:[%s5137_s1 + $0x4c8] sm:$0xff] }
  0x32   :  { %2197 = vmatpush1.bf16.msra.mxu0 %v2196_v19  ;;  %v182_v19 = vld [vmem:[%s5137_s1 + $0x440] sm:$0xff]  ;;  %v197_v27 = vld [vmem:[%s5137_s1 + $0x4b8] sm:$0xff]  ;;  %v204_v47 = vld [vmem:[%s5137_s1 + $0x4f0] sm:$0xff] }
  0x33   :  { %2453 = vmatpush1.bf16.msra.mxu1 %v2452_v20  ;;  %2199 = vmatprep.subr.bf16.mxu0 %v2198_v21  ;;  %v186_v20 = vld [vmem:[%s5137_s1 + $0x460] sm:$0xff]  ;;  %v184_v21 = vld [vmem:[%s5137_s1 + $0x450] sm:$0xff]  ;;  %v2478_v34 = vpack.c.bf16 %v197_v27, %v193_v26  ;;  %v201_v38 = vld [vmem:[%s5137_s1 + $0x4d8] sm:$0xff] }
  0x34   :  { %2455 = vmatprep.subr.bf16.mxu1 %v2454_v25  ;;  %v195_v25 = vld [vmem:[%s5137_s1 + $0x4a8] sm:$0xff]  ;;  %v2220_v28 = vpack.c.bf16 %v186_v20, %v182_v19  ;;  %v2476_v29 = vpack.c.bf16 %v188_v23, %v184_v21  ;;  %v205_v39 = vld [vmem:[%s5137_s1 + $0x4f8] sm:$0xff]  ;;  %v212_v59 = vld [vmem:[%s5137_s1 + $0x530] sm:$0xff] }
  0x35   :  { %v2222_v30 = vpack.c.bf16 %v195_v25, %v191_v24  ;;  %v2482_v46 = vpack.c.bf16 %v205_v39, %v201_v38  ;;  %v207_v48 = vld [vmem:[%s5137_s1 + $0x508] sm:$0xff]  ;;  %v209_v50 = vld [vmem:[%s5137_s1 + $0x518] sm:$0xff]  ;;  %v220_v7 = vld [vmem:[%s5137_s1 + $0x570] sm:$0xff] }
  0x36   :  { %2201 = vmatpush1.bf16.msra.mxu0 %v2200_v31  ;;  %v190_v31 = vld [vmem:[%s5137_s1 + $0x480] sm:$0xff]  ;;  %v213_v51 = vld [vmem:[%s5137_s1 + $0x538] sm:$0xff]  ;;  %v215_v60 = vld [vmem:[%s5137_s1 + $0x548] sm:$0xff] }
  0x37   :  { %2457 = vmatpush1.bf16.msra.mxu1 %v2456_v32  ;;  %2203 = vmatprep.subr.bf16.mxu0 %v2202_v33  ;;  %v194_v32 = vld [vmem:[%s5137_s1 + $0x4a0] sm:$0xff]  ;;  %v192_v33 = vld [vmem:[%s5137_s1 + $0x490] sm:$0xff]  ;;  %v2486_v58 = vpack.c.bf16 %v213_v51, %v209_v50  ;;  %v217_v62 = vld [vmem:[%s5137_s1 + $0x558] sm:$0xff] }
  0x38   :  { %2459 = vmatprep.subr.bf16.mxu1 %v2458_v37  ;;  %v203_v37 = vld [vmem:[%s5137_s1 + $0x4e8] sm:$0xff]  ;;  %v2224_v40 = vpack.c.bf16 %v194_v32, %v190_v31  ;;  %v2480_v41 = vpack.c.bf16 %v196_v35, %v192_v33  ;;  %v221_v63 = vld [vmem:[%s5137_s1 + $0x578] sm:$0xff]  ;;  %v222_v13 = vld [vmem:[%s5137_s1 + $0x580] sm:$0xff] }
  0x39   :  { %v2226_v42 = vpack.c.bf16 %v203_v37, %v199_v36  ;;  %v2490_v6 = vpack.c.bf16 %v221_v63, %v217_v62  ;;  %v223_v8 = vld [vmem:[%s5137_s1 + $0x588] sm:$0xff]  ;;  %v225_v10 = vld [vmem:[%s5137_s1 + $0x598] sm:$0xff]  ;;  %v236_v32 = vld [vmem:[%s5137_s1 + $0x5f0] sm:$0xff] }
  0x3a   :  { %2205 = vmatpush1.bf16.msra.mxu0 %v2204_v43  ;;  %v198_v43 = vld [vmem:[%s5137_s1 + $0x4c0] sm:$0xff]  ;;  %v229_v11 = vld [vmem:[%s5137_s1 + $0x5b8] sm:$0xff]  ;;  %v231_v20 = vld [vmem:[%s5137_s1 + $0x5c8] sm:$0xff] }
  0x3b   :  { %2461 = vmatpush1.bf16.msra.mxu1 %v2460_v44  ;;  %2207 = vmatprep.subr.bf16.mxu0 %v2206_v45  ;;  %v202_v44 = vld [vmem:[%s5137_s1 + $0x4e0] sm:$0xff]  ;;  %v200_v45 = vld [vmem:[%s5137_s1 + $0x4d0] sm:$0xff]  ;;  %v2494_v19 = vpack.c.bf16 %v229_v11, %v225_v10  ;;  %v235_v21 = vld [vmem:[%s5137_s1 + $0x5e8] sm:$0xff] }
  0x3c   :  { %2463 = vmatprep.subr.bf16.mxu1 %v2462_v49  ;;  %v211_v49 = vld [vmem:[%s5137_s1 + $0x528] sm:$0xff]  ;;  %v2228_v52 = vpack.c.bf16 %v202_v44, %v198_v43  ;;  %v2484_v53 = vpack.c.bf16 %v204_v47, %v200_v45  ;;  %v233_v23 = vld [vmem:[%s5137_s1 + $0x5d8] sm:$0xff]  ;;  %v2242_v27 = vpack.c.bf16 %v235_v21, %v231_v20  ;;  %v244_v44 = vld [vmem:[%s5137_s1 + $0x630] sm:$0xff] }
  0x3d   :  { %v2230_v54 = vpack.c.bf16 %v211_v49, %v207_v48  ;;  %v237_v24 = vld [vmem:[%s5137_s1 + $0x5f8] sm:$0xff]  ;;  %v239_v33 = vld [vmem:[%s5137_s1 + $0x608] sm:$0xff] }
  0x3e   :  { %2209 = vmatpush1.bf16.msra.mxu0 %v2208_v55  ;;  %v206_v55 = vld [vmem:[%s5137_s1 + $0x500] sm:$0xff]  ;;  %v2498_v31 = vpack.c.bf16 %v237_v24, %v233_v23  ;;  %v241_v35 = vld [vmem:[%s5137_s1 + $0x618] sm:$0xff]  ;;  %v247_v45 = vld [vmem:[%s5137_s1 + $0x648] sm:$0xff] }
  0x3f   :  { %2465 = vmatpush1.bf16.msra.mxu1 %v2464_v56  ;;  %2211 = vmatprep.subr.bf16.mxu0 %v2210_v57  ;;  %v210_v56 = vld [vmem:[%s5137_s1 + $0x520] sm:$0xff]  ;;  %v208_v57 = vld [vmem:[%s5137_s1 + $0x510] sm:$0xff]  ;;  %v245_v36 = vld [vmem:[%s5137_s1 + $0x638] sm:$0xff] }
  0x40   :  { %2467 = vmatprep.subr.bf16.mxu1 %v2466_v61  ;;  %v219_v61 = vld [vmem:[%s5137_s1 + $0x568] sm:$0xff]  ;;  %v2232_v0 = vpack.c.bf16 %v210_v56, %v206_v55  ;;  %v2488_v1 = vpack.c.bf16 %v212_v59, %v208_v57  ;;  %v2502_v43 = vpack.c.bf16 %v245_v36, %v241_v35  ;;  %v249_v47 = vld [vmem:[%s5137_s1 + $0x658] sm:$0xff]  ;;  %v252_v56 = vld [vmem:[%s5137_s1 + $0x670] sm:$0xff] }
  0x41   :  { %v2234_v2 = vpack.c.bf16 %v219_v61, %v215_v60  ;;  %v253_v48 = vld [vmem:[%s5137_s1 + $0x678] sm:$0xff]  ;;  %v255_v57 = vld [vmem:[%s5137_s1 + $0x688] sm:$0xff]  ;;  %v270_v24 = vld [vmem:[%s5137_s1 + $0x700] sm:$0xff] }
  0x42   :  { %2213 = vmatpush1.bf16.msra.mxu0 %v2212_v3  ;;  %v214_v3 = vld [vmem:[%s5137_s1 + $0x540] sm:$0xff]  ;;  %v2506_v55 = vpack.c.bf16 %v253_v48, %v249_v47  ;;  %v257_v59 = vld [vmem:[%s5137_s1 + $0x698] sm:$0xff] }
  0x43   :  { %2469 = vmatpush1.bf16.msra.mxu1 %v2468_v4  ;;  %2215 = vmatprep.subr.bf16.mxu0 %v2214_v5  ;;  %v218_v4 = vld [vmem:[%s5137_s1 + $0x560] sm:$0xff]  ;;  %v216_v5 = vld [vmem:[%s5137_s1 + $0x550] sm:$0xff]  ;;  %v261_v60 = vld [vmem:[%s5137_s1 + $0x6b8] sm:$0xff] }
  0x44   :  { %2471 = vmatprep.subr.bf16.mxu1 %v2470_v9  ;;  %v227_v9 = vld [vmem:[%s5137_s1 + $0x5a8] sm:$0xff]  ;;  %v2236_v12 = vpack.c.bf16 %v218_v4, %v214_v3  ;;  %v2492_v14 = vpack.c.bf16 %v220_v7, %v216_v5  ;;  %v2510_v3 = vpack.c.bf16 %v261_v60, %v257_v59  ;;  %v260_v4 = vld [vmem:[%s5137_s1 + $0x6b0] sm:$0xff]  ;;  %v265_v7 = vld [vmem:[%s5137_s1 + $0x6d8] sm:$0xff] }
  0x45   :  { %645 = vmatmul.mubr.f32.vlgmr.msra.gmra.mrb[0].mxu0 %v38_v15  ;;  %v263_v5 = vld [vmem:[%s5137_s1 + $0x6c8] sm:$0xff]  ;;  %v277_v20 = vld [vmem:[%s5137_s1 + $0x738] sm:$0xff]  ;;  %v278_v36 = vld [vmem:[%s5137_s1 + $0x740] sm:$0xff] }
  0x46   :  { %2217 = vmatpush1.bf16.msra.mxu0 %v2216_v16  ;;  %929 = vmatmul.mubr.f32.vlgmr.msra.gmra.mrb[0].mxu1 %v38_v15  ;;  %v2238_v15 = vpack.c.bf16 %v227_v9, %v223_v8  ;;  %v226_v16 = vld [vmem:[%s5137_s1 + $0x5a0] sm:$0xff]  ;;  %v269_v8 = vld [vmem:[%s5137_s1 + $0x6f8] sm:$0xff] }
  0x47   :  { %2473 = vmatpush1.bf16.msra.mxu1 %v2472_v17  ;;  %2219 = vmatprep.subr.bf16.mxu0 %v2218_v18  ;;  %v224_v17 = vld [vmem:[%s5137_s1 + $0x590] sm:$0xff]  ;;  %v2240_v25 = vpack.c.bf16 %v226_v16, %v222_v13  ;;  %v266_v13 = vld [vmem:[%s5137_s1 + $0x6e0] sm:$0xff] }
  0x48   :  { %2475 = vmatprep.subr.bf16.mxu1 %v2474_v22  ;;  %v228_v18 = vld [vmem:[%s5137_s1 + $0x5b0] sm:$0xff]  ;;  %v41_v22 = vld [vmem:[%s5138_s0 + $0x18] sm:$0xff]  ;;  %v286_v48 = vld [vmem:[%s5137_s1 + $0x780] sm:$0xff] }
  0x49   :  { %715 = vmatprep.mubr.f32.mxu0 %v41_v22  ;;  %999 = vmatprep.mubr.f32.mxu1 %v41_v22  ;;  %v2496_v26 = vpack.c.bf16 %v228_v18, %v224_v17  ;;  %v268_v16 = vld [vmem:[%s5137_s1 + $0x6f0] sm:$0xff]  ;;  %v271_v17 = vld [vmem:[%s5137_s1 + $0x708] sm:$0xff]  ;;  %v294_v60 = vld [vmem:[%s5137_s1 + $0x7c0] sm:$0xff] }
  0x4a   :  { %2221 = vmatpush1.bf16.msra.mxu0 %v2220_v28  ;;  %v230_v28 = vld [vmem:[%s5137_s1 + $0x5c0] sm:$0xff]  ;;  %v275_v18 = vld [vmem:[%s5137_s1 + $0x728] sm:$0xff] }
  0x4b   :  { %2477 = vmatpush1.bf16.msra.mxu1 %v2476_v29  ;;  %2223 = vmatprep.subr.bf16.mxu0 %v2222_v30  ;;  %v234_v29 = vld [vmem:[%s5137_s1 + $0x5e0] sm:$0xff]  ;;  %v232_v30 = vld [vmem:[%s5137_s1 + $0x5d0] sm:$0xff]  ;;  %v2262_v23 = vpack.c.bf16 %v275_v18, %v271_v17 }
  0x4c   :  { %2479 = vmatprep.subr.bf16.mxu1 %v2478_v34  ;;  %v243_v34 = vld [vmem:[%s5137_s1 + $0x628] sm:$0xff]  ;;  %v2244_v37 = vpack.c.bf16 %v234_v29, %v230_v28  ;;  %v2500_v38 = vpack.c.bf16 %v236_v32, %v232_v30  ;;  %v276_v28 = vld [vmem:[%s5137_s1 + $0x730] sm:$0xff]  ;;  %v285_v32 = vld [vmem:[%s5137_s1 + $0x778] sm:$0xff] }
  0x4d   :  { %v2246_v39 = vpack.c.bf16 %v243_v34, %v239_v33  ;;  %v279_v29 = vld [vmem:[%s5137_s1 + $0x748] sm:$0xff]  ;;  %v40_v17 = vld [vmem:[%s5138_s0 + $0x10] sm:$0xff] }
  0x4e   :  { %2225 = vmatpush1.bf16.msra.mxu0 %v2224_v40  ;;  %v238_v40 = vld [vmem:[%s5137_s1 + $0x600] sm:$0xff]  ;;  %v283_v30 = vld [vmem:[%s5137_s1 + $0x768] sm:$0xff] }
  0x4f   :  { %2481 = vmatpush1.bf16.msra.mxu1 %v2480_v41  ;;  %2227 = vmatprep.subr.bf16.mxu0 %v2226_v42  ;;  %v242_v41 = vld [vmem:[%s5137_s1 + $0x620] sm:$0xff]  ;;  %v240_v42 = vld [vmem:[%s5137_s1 + $0x610] sm:$0xff]  ;;  %v2266_v35 = vpack.c.bf16 %v283_v30, %v279_v29  ;;  %v325_v29 = vld [vmem:[%s5137_s1 + $0x8b8] sm:$0xff] }
  0x50   :  { %2483 = vmatprep.subr.bf16.mxu1 %v2482_v46  ;;  %v251_v46 = vld [vmem:[%s5137_s1 + $0x668] sm:$0xff]  ;;  %v2248_v49 = vpack.c.bf16 %v242_v41, %v238_v40  ;;  %v2504_v50 = vpack.c.bf16 %v244_v44, %v240_v42  ;;  %v284_v40 = vld [vmem:[%s5137_s1 + $0x770] sm:$0xff]  ;;  %v293_v44 = vld [vmem:[%s5137_s1 + $0x7b8] sm:$0xff] }
  0x51   :  { %v2250_v51 = vpack.c.bf16 %v251_v46, %v247_v45  ;;  %v287_v41 = vld [vmem:[%s5137_s1 + $0x788] sm:$0xff] }
  0x52   :  { %2229 = vmatpush1.bf16.msra.mxu0 %v2228_v52  ;;  %v246_v52 = vld [vmem:[%s5137_s1 + $0x640] sm:$0xff]  ;;  %v291_v42 = vld [vmem:[%s5137_s1 + $0x7a8] sm:$0xff] }
  0x53   :  { %2485 = vmatpush1.bf16.msra.mxu1 %v2484_v53  ;;  %2231 = vmatprep.subr.bf16.mxu0 %v2230_v54  ;;  %v250_v53 = vld [vmem:[%s5137_s1 + $0x660] sm:$0xff]  ;;  %v248_v54 = vld [vmem:[%s5137_s1 + $0x650] sm:$0xff]  ;;  %v2270_v47 = vpack.c.bf16 %v291_v42, %v287_v41  ;;  %v43_v30 = vld [vmem:[%s5138_s0 + $0x28] sm:$0xff] }
  0x54   :  { %2487 = vmatprep.subr.bf16.mxu1 %v2486_v58  ;;  %v259_v58 = vld [vmem:[%s5137_s1 + $0x6a8] sm:$0xff]  ;;  %v2252_v61 = vpack.c.bf16 %v250_v53, %v246_v52  ;;  %v2508_v62 = vpack.c.bf16 %v252_v56, %v248_v54  ;;  %v292_v52 = vld [vmem:[%s5137_s1 + $0x7b0] sm:$0xff]  ;;  %v301_v56 = vld [vmem:[%s5137_s1 + $0x7f8] sm:$0xff] }
  0x55   :  { %v2254_v63 = vpack.c.bf16 %v259_v58, %v255_v57  ;;  %v295_v53 = vld [vmem:[%s5137_s1 + $0x7c8] sm:$0xff]  ;;  %v329_v41 = vld [vmem:[%s5137_s1 + $0x8d8] sm:$0xff] }
  0x56   :  { %2233 = vmatpush1.bf16.msra.mxu0 %v2232_v0  ;;  %v254_v0 = vld [vmem:[%s5137_s1 + $0x680] sm:$0xff]  ;;  %v299_v54 = vld [vmem:[%s5137_s1 + $0x7e8] sm:$0xff]  ;;  %v333_v42 = vld [vmem:[%s5137_s1 + $0x8f8] sm:$0xff] }
  0x57   :  { %2489 = vmatpush1.bf16.msra.mxu1 %v2488_v1  ;;  %2235 = vmatprep.subr.bf16.mxu0 %v2234_v2  ;;  %v258_v1 = vld [vmem:[%s5137_s1 + $0x6a0] sm:$0xff]  ;;  %v256_v2 = vld [vmem:[%s5137_s1 + $0x690] sm:$0xff]  ;;  %v2274_v59 = vpack.c.bf16 %v299_v54, %v295_v53  ;;  %v337_v53 = vld [vmem:[%s5137_s1 + $0x918] sm:$0xff] }
  0x58   :  { %2491 = vmatprep.subr.bf16.mxu1 %v2490_v6  ;;  %v267_v6 = vld [vmem:[%s5137_s1 + $0x6e8] sm:$0xff]  ;;  %v2256_v9 = vpack.c.bf16 %v258_v1, %v254_v0  ;;  %v2512_v10 = vpack.c.bf16 %v260_v4, %v256_v2  ;;  %v300_v0 = vld [vmem:[%s5137_s1 + $0x7f0] sm:$0xff]  ;;  %v309_v4 = vld [vmem:[%s5137_s1 + $0x838] sm:$0xff] }
  0x59   :  { %v2258_v11 = vpack.c.bf16 %v267_v6, %v263_v5  ;;  %v303_v1 = vld [vmem:[%s5137_s1 + $0x808] sm:$0xff]  ;;  %v341_v54 = vld [vmem:[%s5137_s1 + $0x938] sm:$0xff] }
  0x5a   :  { %2237 = vmatpush1.bf16.msra.mxu0 %v2236_v12  ;;  %v262_v12 = vld [vmem:[%s5137_s1 + $0x6c0] sm:$0xff]  ;;  %v307_v2 = vld [vmem:[%s5137_s1 + $0x828] sm:$0xff] }
  0x5b   :  { %2493 = vmatpush1.bf16.msra.mxu1 %v2492_v14  ;;  %2239 = vmatprep.subr.bf16.mxu0 %v2238_v15  ;;  %v264_v14 = vld [vmem:[%s5137_s1 + $0x6d0] sm:$0xff]  ;;  %v2514_v15 = vpack.c.bf16 %v269_v8, %v265_v7  ;;  %v2260_v21 = vpack.c.bf16 %v266_v13, %v262_v12  ;;  %v2278_v7 = vpack.c.bf16 %v307_v2, %v303_v1  ;;  %v302_v8 = vld [vmem:[%s5137_s1 + $0x800] sm:$0xff]  ;;  %v311_v13 = vld [vmem:[%s5137_s1 + $0x848] sm:$0xff] }
  0x5c   :  { %2495 = vmatprep.subr.bf16.mxu1 %v2494_v19  ;;  %v273_v19 = vld [vmem:[%s5137_s1 + $0x718] sm:$0xff]  ;;  %v2516_v22 = vpack.c.bf16 %v268_v16, %v264_v14  ;;  %v308_v12 = vld [vmem:[%s5137_s1 + $0x830] sm:$0xff]  ;;  %v315_v14 = vld [vmem:[%s5137_s1 + $0x868] sm:$0xff] }
  0x5d   :  { %v317_v16 = vld [vmem:[%s5137_s1 + $0x878] sm:$0xff] }
  0x5e   :  { %2241 = vmatpush1.bf16.msra.mxu0 %v2240_v25  ;;  %v274_v25 = vld [vmem:[%s5137_s1 + $0x720] sm:$0xff]  ;;  %v345_v1 = vld [vmem:[%s5137_s1 + $0x958] sm:$0xff] }
  0x5f   :  { %2497 = vmatpush1.bf16.msra.mxu1 %v2496_v26  ;;  %2243 = vmatprep.subr.bf16.mxu0 %v2242_v27  ;;  %v272_v26 = vld [vmem:[%s5137_s1 + $0x710] sm:$0xff]  ;;  %v2518_v27 = vpack.c.bf16 %v277_v20, %v273_v19  ;;  %v2264_v33 = vpack.c.bf16 %v274_v25, %v270_v24  ;;  %v2282_v20 = vpack.c.bf16 %v315_v14, %v311_v13  ;;  %v349_v2 = vld [vmem:[%s5137_s1 + $0x978] sm:$0xff] }
  0x60   :  { %2499 = vmatprep.subr.bf16.mxu1 %v2498_v31  ;;  %v281_v31 = vld [vmem:[%s5137_s1 + $0x758] sm:$0xff]  ;;  %v2520_v34 = vpack.c.bf16 %v276_v28, %v272_v26  ;;  %v316_v25 = vld [vmem:[%s5137_s1 + $0x870] sm:$0xff]  ;;  %v319_v26 = vld [vmem:[%s5137_s1 + $0x888] sm:$0xff] }
  0x61   :  { %v321_v28 = vld [vmem:[%s5137_s1 + $0x898] sm:$0xff] }
  0x62   :  { %2245 = vmatpush1.bf16.msra.mxu0 %v2244_v37  ;;  %v282_v37 = vld [vmem:[%s5137_s1 + $0x760] sm:$0xff]  ;;  %v353_v13 = vld [vmem:[%s5137_s1 + $0x998] sm:$0xff] }
  0x63   :  { %2501 = vmatpush1.bf16.msra.mxu1 %v2500_v38  ;;  %2247 = vmatprep.subr.bf16.mxu0 %v2246_v39  ;;  %v280_v38 = vld [vmem:[%s5137_s1 + $0x750] sm:$0xff]  ;;  %v2522_v39 = vpack.c.bf16 %v285_v32, %v281_v31  ;;  %v2268_v45 = vpack.c.bf16 %v282_v37, %v278_v36  ;;  %v2542_v37 = vpack.c.bf16 %v325_v29, %v321_v28  ;;  %v357_v14 = vld [vmem:[%s5137_s1 + $0x9b8] sm:$0xff] }
  0x64   :  { %2503 = vmatprep.subr.bf16.mxu1 %v2502_v43  ;;  %v289_v43 = vld [vmem:[%s5137_s1 + $0x798] sm:$0xff]  ;;  %v2524_v46 = vpack.c.bf16 %v284_v40, %v280_v38  ;;  %v320_v36 = vld [vmem:[%s5137_s1 + $0x890] sm:$0xff]  ;;  %v331_v40 = vld [vmem:[%s5137_s1 + $0x8e8] sm:$0xff] }
  0x65   :  { %v324_v38 = vld [vmem:[%s5137_s1 + $0x8b0] sm:$0xff] }
  0x66   :  { %2249 = vmatpush1.bf16.msra.mxu0 %v2248_v49  ;;  %v290_v49 = vld [vmem:[%s5137_s1 + $0x7a0] sm:$0xff] }
  0x67   :  { %2505 = vmatpush1.bf16.msra.mxu1 %v2504_v50  ;;  %2251 = vmatprep.subr.bf16.mxu0 %v2250_v51  ;;  %v288_v50 = vld [vmem:[%s5137_s1 + $0x790] sm:$0xff]  ;;  %v2526_v51 = vpack.c.bf16 %v293_v44, %v289_v43  ;;  %v2272_v57 = vpack.c.bf16 %v290_v49, %v286_v48  ;;  %v2544_v44 = vpack.c.bf16 %v324_v38, %v320_v36  ;;  %v371_v36 = vld [vmem:[%s5137_s1 + $0xa28] sm:$0xff]  ;;  %v373_v38 = vld [vmem:[%s5137_s1 + $0xa38] sm:$0xff] }
  0x68   :  { %2507 = vmatprep.subr.bf16.mxu1 %v2506_v55  ;;  %v297_v55 = vld [vmem:[%s5137_s1 + $0x7d8] sm:$0xff]  ;;  %v2528_v58 = vpack.c.bf16 %v292_v52, %v288_v50  ;;  %v328_v48 = vld [vmem:[%s5137_s1 + $0x8d0] sm:$0xff]  ;;  %v2546_v49 = vpack.c.bf16 %v333_v42, %v329_v41  ;;  %v339_v52 = vld [vmem:[%s5137_s1 + $0x928] sm:$0xff] }
  0x69   :  { %v332_v50 = vld [vmem:[%s5137_s1 + $0x8f0] sm:$0xff]  ;;  %v366_v42 = vld [vmem:[%s5137_s1 + $0xa00] sm:$0xff] }
  0x6a   :  { %2253 = vmatpush1.bf16.msra.mxu0 %v2252_v61  ;;  %v298_v61 = vld [vmem:[%s5137_s1 + $0x7e0] sm:$0xff] }
  0x6b   :  { %2509 = vmatpush1.bf16.msra.mxu1 %v2508_v62  ;;  %2255 = vmatprep.subr.bf16.mxu0 %v2254_v63  ;;  %v296_v62 = vld [vmem:[%s5137_s1 + $0x7d0] sm:$0xff]  ;;  %v2530_v63 = vpack.c.bf16 %v301_v56, %v297_v55  ;;  %v2276_v5 = vpack.c.bf16 %v298_v61, %v294_v60  ;;  %v2548_v56 = vpack.c.bf16 %v332_v50, %v328_v48  ;;  %v379_v48 = vld [vmem:[%s5137_s1 + $0xa68] sm:$0xff]  ;;  %v381_v50 = vld [vmem:[%s5137_s1 + $0xa78] sm:$0xff] }
  0x6c   :  { %2511 = vmatprep.subr.bf16.mxu1 %v2510_v3  ;;  %v305_v3 = vld [vmem:[%s5137_s1 + $0x818] sm:$0xff]  ;;  %v2532_v6 = vpack.c.bf16 %v300_v0, %v296_v62  ;;  %v336_v60 = vld [vmem:[%s5137_s1 + $0x910] sm:$0xff]  ;;  %v2550_v61 = vpack.c.bf16 %v341_v54, %v337_v53  ;;  %v347_v0 = vld [vmem:[%s5137_s1 + $0x968] sm:$0xff] }
  0x6d   :  { %v340_v62 = vld [vmem:[%s5137_s1 + $0x930] sm:$0xff]  ;;  %v374_v54 = vld [vmem:[%s5137_s1 + $0xa40] sm:$0xff] }
  0x6e   :  { %2257 = vmatpush1.bf16.msra.mxu0 %v2256_v9  ;;  %v306_v9 = vld [vmem:[%s5137_s1 + $0x820] sm:$0xff] }
  0x6f   :  { %2513 = vmatpush1.bf16.msra.mxu1 %v2512_v10  ;;  %2259 = vmatprep.subr.bf16.mxu0 %v2258_v11  ;;  %v304_v10 = vld [vmem:[%s5137_s1 + $0x810] sm:$0xff]  ;;  %v2534_v11 = vpack.c.bf16 %v309_v4, %v305_v3  ;;  %v2280_v18 = vpack.c.bf16 %v306_v9, %v302_v8  ;;  %v2552_v4 = vpack.c.bf16 %v340_v62, %v336_v60  ;;  %v387_v60 = vld [vmem:[%s5137_s1 + $0xaa8] sm:$0xff]  ;;  %v389_v62 = vld [vmem:[%s5137_s1 + $0xab8] sm:$0xff] }
  0x70   :  { %2515 = vmatprep.subr.bf16.mxu1 %v2514_v15  ;;  %v313_v15 = vld [vmem:[%s5137_s1 + $0x858] sm:$0xff]  ;;  %v2536_v19 = vpack.c.bf16 %v308_v12, %v304_v10  ;;  %v344_v8 = vld [vmem:[%s5137_s1 + $0x950] sm:$0xff]  ;;  %v2554_v9 = vpack.c.bf16 %v349_v2, %v345_v1  ;;  %v355_v12 = vld [vmem:[%s5137_s1 + $0x9a8] sm:$0xff] }
  0x71   :  { %v2538_v24 = vpack.c.bf16 %v317_v16, %v313_v15  ;;  %v348_v10 = vld [vmem:[%s5137_s1 + $0x970] sm:$0xff]  ;;  %v382_v2 = vld [vmem:[%s5137_s1 + $0xa80] sm:$0xff] }
  0x72   :  { %2261 = vmatpush1.bf16.msra.mxu0 %v2260_v21  ;;  %v310_v21 = vld [vmem:[%s5137_s1 + $0x840] sm:$0xff]  ;;  %v2556_v16 = vpack.c.bf16 %v348_v10, %v344_v8  ;;  %v395_v8 = vld [vmem:[%s5137_s1 + $0xae8] sm:$0xff]  ;;  %v397_v10 = vld [vmem:[%s5137_s1 + $0xaf8] sm:$0xff] }
  0x73   :  { %2517 = vmatpush1.bf16.msra.mxu1 %v2516_v22  ;;  %2263 = vmatprep.subr.bf16.mxu0 %v2262_v23  ;;  %v314_v22 = vld [vmem:[%s5137_s1 + $0x860] sm:$0xff]  ;;  %v312_v23 = vld [vmem:[%s5137_s1 + $0x850] sm:$0xff] }
  0x74   :  { %2519 = vmatprep.subr.bf16.mxu1 %v2518_v27  ;;  %v323_v27 = vld [vmem:[%s5137_s1 + $0x8a8] sm:$0xff]  ;;  %v2284_v31 = vpack.c.bf16 %v314_v22, %v310_v21  ;;  %v2540_v32 = vpack.c.bf16 %v316_v25, %v312_v23  ;;  %v2558_v21 = vpack.c.bf16 %v357_v14, %v353_v13  ;;  %v356_v22 = vld [vmem:[%s5137_s1 + $0x9b0] sm:$0xff]  ;;  %v361_v25 = vld [vmem:[%s5137_s1 + $0x9d8] sm:$0xff] }
  0x75   :  { %v359_v23 = vld [vmem:[%s5137_s1 + $0x9c8] sm:$0xff]  ;;  %v390_v14 = vld [vmem:[%s5137_s1 + $0xac0] sm:$0xff] }
  0x76   :  { %2265 = vmatpush1.bf16.msra.mxu0 %v2264_v33  ;;  %v2286_v33 = vpack.c.bf16 %v323_v27, %v319_v26  ;;  %v365_v26 = vld [vmem:[%s5137_s1 + $0x9f8] sm:$0xff] }
  0x77   :  { %2521 = vmatpush1.bf16.msra.mxu1 %v2520_v34  ;;  %2267 = vmatprep.subr.bf16.mxu0 %v2266_v35  ;;  %v318_v34 = vld [vmem:[%s5137_s1 + $0x880] sm:$0xff] }
  0x78   :  { %2523 = vmatprep.subr.bf16.mxu1 %v2522_v39  ;;  %v322_v35 = vld [vmem:[%s5137_s1 + $0x8a0] sm:$0xff]  ;;  %v327_v39 = vld [vmem:[%s5137_s1 + $0x8c8] sm:$0xff] }
  0x79   :  { %v2288_v43 = vpack.c.bf16 %v322_v35, %v318_v34  ;;  %v364_v34 = vld [vmem:[%s5137_s1 + $0x9f0] sm:$0xff]  ;;  %v367_v35 = vld [vmem:[%s5137_s1 + $0xa08] sm:$0xff] }
  0x7a   :  { %2269 = vmatpush1.bf16.msra.mxu0 %v2268_v45  ;;  %v2290_v45 = vpack.c.bf16 %v331_v40, %v327_v39  ;;  %v2310_v41 = vpack.c.bf16 %v371_v36, %v367_v35 }
  0x7b   :  { %2525 = vmatpush1.bf16.msra.mxu1 %v2524_v46  ;;  %2271 = vmatprep.subr.bf16.mxu0 %v2270_v47  ;;  %v326_v46 = vld [vmem:[%s5137_s1 + $0x8c0] sm:$0xff] }
  0x7c   :  { %2527 = vmatprep.subr.bf16.mxu1 %v2526_v51  ;;  %v330_v47 = vld [vmem:[%s5137_s1 + $0x8e0] sm:$0xff]  ;;  %v335_v51 = vld [vmem:[%s5137_s1 + $0x908] sm:$0xff] }
  0x7d   :  { %v2292_v55 = vpack.c.bf16 %v330_v47, %v326_v46  ;;  %v372_v46 = vld [vmem:[%s5137_s1 + $0xa30] sm:$0xff]  ;;  %v375_v47 = vld [vmem:[%s5137_s1 + $0xa48] sm:$0xff] }
  0x7e   :  { %2273 = vmatpush1.bf16.msra.mxu0 %v2272_v57  ;;  %v2294_v57 = vpack.c.bf16 %v339_v52, %v335_v51  ;;  %v2314_v53 = vpack.c.bf16 %v379_v48, %v375_v47 }
  0x7f   :  { %2529 = vmatpush1.bf16.msra.mxu1 %v2528_v58  ;;  %2275 = vmatprep.subr.bf16.mxu0 %v2274_v59  ;;  %v334_v58 = vld [vmem:[%s5137_s1 + $0x900] sm:$0xff] }
  0x80   :  { %2531 = vmatprep.subr.bf16.mxu1 %v2530_v63  ;;  %v338_v59 = vld [vmem:[%s5137_s1 + $0x920] sm:$0xff]  ;;  %v343_v63 = vld [vmem:[%s5137_s1 + $0x948] sm:$0xff] }
  0x81   :  { %v2296_v3 = vpack.c.bf16 %v338_v59, %v334_v58  ;;  %v380_v58 = vld [vmem:[%s5137_s1 + $0xa70] sm:$0xff]  ;;  %v383_v59 = vld [vmem:[%s5137_s1 + $0xa88] sm:$0xff] }
  0x82   :  { %2277 = vmatpush1.bf16.msra.mxu0 %v2276_v5  ;;  %v2298_v5 = vpack.c.bf16 %v347_v0, %v343_v63  ;;  %v2318_v1 = vpack.c.bf16 %v387_v60, %v383_v59 }
  0x83   :  { %2533 = vmatpush1.bf16.msra.mxu1 %v2532_v6  ;;  %2279 = vmatprep.subr.bf16.mxu0 %v2278_v7  ;;  %v342_v6 = vld [vmem:[%s5137_s1 + $0x940] sm:$0xff] }
  0x84   :  { %2535 = vmatprep.subr.bf16.mxu1 %v2534_v11  ;;  %v346_v7 = vld [vmem:[%s5137_s1 + $0x960] sm:$0xff]  ;;  %v351_v11 = vld [vmem:[%s5137_s1 + $0x988] sm:$0xff] }
  0x85   :  { %716 = vmatmul.mubr.f32.vlgmr.msra.gmra.mrb[0].mxu0 %v40_v17  ;;  %v2300_v15 = vpack.c.bf16 %v346_v7, %v342_v6  ;;  %v388_v6 = vld [vmem:[%s5137_s1 + $0xab0] sm:$0xff]  ;;  %v391_v7 = vld [vmem:[%s5137_s1 + $0xac8] sm:$0xff] }
  0x86   :  { %2281 = vmatpush1.bf16.msra.mxu0 %v2280_v18  ;;  %1000 = vmatmul.mubr.f32.vlgmr.msra.gmra.mrb[0].mxu1 %v40_v17  ;;  %v2302_v17 = vpack.c.bf16 %v355_v12, %v351_v11  ;;  %v350_v18 = vld [vmem:[%s5137_s1 + $0x980] sm:$0xff]  ;;  %v2322_v13 = vpack.c.bf16 %v395_v8, %v391_v7 }
  0x87   :  { %2537 = vmatpush1.bf16.msra.mxu1 %v2536_v19  ;;  %2283 = vmatprep.subr.bf16.mxu0 %v2282_v20  ;;  %v354_v19 = vld [vmem:[%s5137_s1 + $0x9a0] sm:$0xff]  ;;  %v352_v20 = vld [vmem:[%s5137_s1 + $0x990] sm:$0xff] }
  0x88   :  { %2539 = vmatprep.subr.bf16.mxu1 %v2538_v24  ;;  %786 = vmatprep.mubr.f32.mxu0 %v43_v30  ;;  %v363_v24 = vld [vmem:[%s5137_s1 + $0x9e8] sm:$0xff]  ;;  %v2304_v27 = vpack.c.bf16 %v354_v19, %v350_v18  ;;  %v2560_v28 = vpack.c.bf16 %v356_v22, %v352_v20  ;;  %v396_v18 = vld [vmem:[%s5137_s1 + $0xaf0] sm:$0xff]  ;;  %v405_v22 = vld [vmem:[%s5137_s1 + $0xb38] sm:$0xff] }
  0x89   :  { %1070 = vmatprep.mubr.f32.mxu1 %v43_v30  ;;  %v2306_v29 = vpack.c.bf16 %v363_v24, %v359_v23  ;;  %v358_v30 = vld [vmem:[%s5137_s1 + $0x9c0] sm:$0xff]  ;;  %v399_v19 = vld [vmem:[%s5137_s1 + $0xb08] sm:$0xff] }
  0x8a   :  { %2285 = vmatpush1.bf16.msra.mxu0 %v2284_v31  ;;  %v362_v31 = vld [vmem:[%s5137_s1 + $0x9e0] sm:$0xff]  ;;  %v403_v20 = vld [vmem:[%s5137_s1 + $0xb28] sm:$0xff] }
  0x8b   :  { %2541 = vmatpush1.bf16.msra.mxu1 %v2540_v32  ;;  %2287 = vmatprep.subr.bf16.mxu0 %v2286_v33  ;;  %v360_v32 = vld [vmem:[%s5137_s1 + $0x9d0] sm:$0xff]  ;;  %v2562_v33 = vpack.c.bf16 %v365_v26, %v361_v25  ;;  %v2308_v39 = vpack.c.bf16 %v362_v31, %v358_v30  ;;  %v2326_v25 = vpack.c.bf16 %v403_v20, %v399_v19  ;;  %v398_v26 = vld [vmem:[%s5137_s1 + $0xb00] sm:$0xff]  ;;  %v407_v31 = vld [vmem:[%s5137_s1 + $0xb48] sm:$0xff] }
  0x8c   :  { %2543 = vmatprep.subr.bf16.mxu1 %v2542_v37  ;;  %v369_v37 = vld [vmem:[%s5137_s1 + $0xa18] sm:$0xff]  ;;  %v2564_v40 = vpack.c.bf16 %v364_v34, %v360_v32  ;;  %v404_v30 = vld [vmem:[%s5137_s1 + $0xb30] sm:$0xff]  ;;  %v411_v32 = vld [vmem:[%s5137_s1 + $0xb68] sm:$0xff] }
  0x8d   :  { %v413_v34 = vld [vmem:[%s5137_s1 + $0xb78] sm:$0xff]  ;;  %v42_v19 = vld [vmem:[%s5138_s0 + $0x20] sm:$0xff] }
  0x8e   :  { %2289 = vmatpush1.bf16.msra.mxu0 %v2288_v43  ;;  %v370_v43 = vld [vmem:[%s5137_s1 + $0xa20] sm:$0xff] }
  0x8f   :  { %2545 = vmatpush1.bf16.msra.mxu1 %v2544_v44  ;;  %2291 = vmatprep.subr.bf16.mxu0 %v2290_v45  ;;  %v368_v44 = vld [vmem:[%s5137_s1 + $0xa10] sm:$0xff]  ;;  %v2566_v45 = vpack.c.bf16 %v373_v38, %v369_v37  ;;  %v2312_v51 = vpack.c.bf16 %v370_v43, %v366_v42  ;;  %v2330_v37 = vpack.c.bf16 %v411_v32, %v407_v31  ;;  %v406_v38 = vld [vmem:[%s5137_s1 + $0xb40] sm:$0xff]  ;;  %v415_v43 = vld [vmem:[%s5137_s1 + $0xb88] sm:$0xff] }
  0x90   :  { %2547 = vmatprep.subr.bf16.mxu1 %v2546_v49  ;;  %v377_v49 = vld [vmem:[%s5137_s1 + $0xa58] sm:$0xff]  ;;  %v2568_v52 = vpack.c.bf16 %v372_v46, %v368_v44  ;;  %v412_v42 = vld [vmem:[%s5137_s1 + $0xb70] sm:$0xff]  ;;  %v419_v44 = vld [vmem:[%s5137_s1 + $0xba8] sm:$0xff] }
  0x91   :  { %v421_v46 = vld [vmem:[%s5137_s1 + $0xbb8] sm:$0xff] }
  0x92   :  { %2293 = vmatpush1.bf16.msra.mxu0 %v2292_v55  ;;  %v378_v55 = vld [vmem:[%s5137_s1 + $0xa60] sm:$0xff]  ;;  %v453_v31 = vld [vmem:[%s5137_s1 + $0xcb8] sm:$0xff] }
  0x93   :  { %2549 = vmatpush1.bf16.msra.mxu1 %v2548_v56  ;;  %2295 = vmatprep.subr.bf16.mxu0 %v2294_v57  ;;  %v376_v56 = vld [vmem:[%s5137_s1 + $0xa50] sm:$0xff]  ;;  %v2570_v57 = vpack.c.bf16 %v381_v50, %v377_v49  ;;  %v2316_v63 = vpack.c.bf16 %v378_v55, %v374_v54  ;;  %v2334_v49 = vpack.c.bf16 %v419_v44, %v415_v43  ;;  %v414_v50 = vld [vmem:[%s5137_s1 + $0xb80] sm:$0xff]  ;;  %v423_v55 = vld [vmem:[%s5137_s1 + $0xbc8] sm:$0xff] }
  0x94   :  { %2551 = vmatprep.subr.bf16.mxu1 %v2550_v61  ;;  %v385_v61 = vld [vmem:[%s5137_s1 + $0xa98] sm:$0xff]  ;;  %v2572_v0 = vpack.c.bf16 %v380_v58, %v376_v56  ;;  %v420_v54 = vld [vmem:[%s5137_s1 + $0xbb0] sm:$0xff]  ;;  %v427_v56 = vld [vmem:[%s5137_s1 + $0xbe8] sm:$0xff] }
  0x95   :  { %v429_v58 = vld [vmem:[%s5137_s1 + $0xbf8] sm:$0xff] }
  0x96   :  { %2297 = vmatpush1.bf16.msra.mxu0 %v2296_v3  ;;  %v386_v3 = vld [vmem:[%s5137_s1 + $0xaa0] sm:$0xff]  ;;  %v45_v32 = vld [vmem:[%s5138_s0 + $0x38] sm:$0xff] }
  0x97   :  { %2553 = vmatpush1.bf16.msra.mxu1 %v2552_v4  ;;  %2299 = vmatprep.subr.bf16.mxu0 %v2298_v5  ;;  %v384_v4 = vld [vmem:[%s5137_s1 + $0xa90] sm:$0xff]  ;;  %v2574_v5 = vpack.c.bf16 %v389_v62, %v385_v61  ;;  %v2320_v11 = vpack.c.bf16 %v386_v3, %v382_v2  ;;  %v2338_v61 = vpack.c.bf16 %v427_v56, %v423_v55  ;;  %v422_v62 = vld [vmem:[%s5137_s1 + $0xbc0] sm:$0xff]  ;;  %v431_v3 = vld [vmem:[%s5137_s1 + $0xc08] sm:$0xff] }
  0x98   :  { %2555 = vmatprep.subr.bf16.mxu1 %v2554_v9  ;;  %v393_v9 = vld [vmem:[%s5137_s1 + $0xad8] sm:$0xff]  ;;  %v2576_v12 = vpack.c.bf16 %v388_v6, %v384_v4  ;;  %v428_v2 = vld [vmem:[%s5137_s1 + $0xbf0] sm:$0xff]  ;;  %v435_v4 = vld [vmem:[%s5137_s1 + $0xc28] sm:$0xff] }
  0x99   :  { %v437_v6 = vld [vmem:[%s5137_s1 + $0xc38] sm:$0xff] }
  0x9a   :  { %2301 = vmatpush1.bf16.msra.mxu0 %v2300_v15  ;;  %v394_v15 = vld [vmem:[%s5137_s1 + $0xae0] sm:$0xff]  ;;  %v457_v43 = vld [vmem:[%s5137_s1 + $0xcd8] sm:$0xff] }
  0x9b   :  { %2557 = vmatpush1.bf16.msra.mxu1 %v2556_v16  ;;  %2303 = vmatprep.subr.bf16.mxu0 %v2302_v17  ;;  %v392_v16 = vld [vmem:[%s5137_s1 + $0xad0] sm:$0xff]  ;;  %v2578_v17 = vpack.c.bf16 %v397_v10, %v393_v9  ;;  %v2324_v23 = vpack.c.bf16 %v394_v15, %v390_v14  ;;  %v2342_v9 = vpack.c.bf16 %v435_v4, %v431_v3  ;;  %v430_v10 = vld [vmem:[%s5137_s1 + $0xc00] sm:$0xff]  ;;  %v439_v15 = vld [vmem:[%s5137_s1 + $0xc48] sm:$0xff] }
  0x9c   :  { %2559 = vmatprep.subr.bf16.mxu1 %v2558_v21  ;;  %v401_v21 = vld [vmem:[%s5137_s1 + $0xb18] sm:$0xff]  ;;  %v2580_v24 = vpack.c.bf16 %v396_v18, %v392_v16  ;;  %v436_v14 = vld [vmem:[%s5137_s1 + $0xc30] sm:$0xff]  ;;  %v443_v16 = vld [vmem:[%s5137_s1 + $0xc68] sm:$0xff] }
  0x9d   :  { %v445_v18 = vld [vmem:[%s5137_s1 + $0xc78] sm:$0xff] }
  0x9e   :  { %2305 = vmatpush1.bf16.msra.mxu0 %v2304_v27  ;;  %v402_v27 = vld [vmem:[%s5137_s1 + $0xb20] sm:$0xff]  ;;  %v461_v44 = vld [vmem:[%s5137_s1 + $0xcf8] sm:$0xff] }
  0x9f   :  { %2561 = vmatpush1.bf16.msra.mxu1 %v2560_v28  ;;  %2307 = vmatprep.subr.bf16.mxu0 %v2306_v29  ;;  %v400_v28 = vld [vmem:[%s5137_s1 + $0xb10] sm:$0xff]  ;;  %v2582_v29 = vpack.c.bf16 %v405_v22, %v401_v21  ;;  %v2328_v35 = vpack.c.bf16 %v402_v27, %v398_v26  ;;  %v2346_v22 = vpack.c.bf16 %v443_v16, %v439_v15  ;;  %v465_v55 = vld [vmem:[%s5137_s1 + $0xd18] sm:$0xff] }
  0xa0   :  { %2563 = vmatprep.subr.bf16.mxu1 %v2562_v33  ;;  %v409_v33 = vld [vmem:[%s5137_s1 + $0xb58] sm:$0xff]  ;;  %v2584_v36 = vpack.c.bf16 %v404_v30, %v400_v28  ;;  %v444_v27 = vld [vmem:[%s5137_s1 + $0xc70] sm:$0xff]  ;;  %v447_v28 = vld [vmem:[%s5137_s1 + $0xc88] sm:$0xff] }
  0xa1   :  { %v449_v30 = vld [vmem:[%s5137_s1 + $0xc98] sm:$0xff] }
  0xa2   :  { %2309 = vmatpush1.bf16.msra.mxu0 %v2308_v39  ;;  %v410_v39 = vld [vmem:[%s5137_s1 + $0xb60] sm:$0xff]  ;;  %v469_v56 = vld [vmem:[%s5137_s1 + $0xd38] sm:$0xff] }
  0xa3   :  { %2565 = vmatpush1.bf16.msra.mxu1 %v2564_v40  ;;  %2311 = vmatprep.subr.bf16.mxu0 %v2310_v41  ;;  %v408_v40 = vld [vmem:[%s5137_s1 + $0xb50] sm:$0xff]  ;;  %v2586_v41 = vpack.c.bf16 %v413_v34, %v409_v33  ;;  %v2332_v47 = vpack.c.bf16 %v410_v39, %v406_v38  ;;  %v2606_v39 = vpack.c.bf16 %v453_v31, %v449_v30  ;;  %v473_v3 = vld [vmem:[%s5137_s1 + $0xd58] sm:$0xff] }
  0xa4   :  { %2567 = vmatprep.subr.bf16.mxu1 %v2566_v45  ;;  %v417_v45 = vld [vmem:[%s5137_s1 + $0xb98] sm:$0xff]  ;;  %v2588_v48 = vpack.c.bf16 %v412_v42, %v408_v40  ;;  %v448_v38 = vld [vmem:[%s5137_s1 + $0xc90] sm:$0xff]  ;;  %v459_v42 = vld [vmem:[%s5137_s1 + $0xce8] sm:$0xff] }
  0xa5   :  { %v452_v40 = vld [vmem:[%s5137_s1 + $0xcb0] sm:$0xff]  ;;  %v477_v4 = vld [vmem:[%s5137_s1 + $0xd78] sm:$0xff] }
  0xa6   :  { %2313 = vmatpush1.bf16.msra.mxu0 %v2312_v51  ;;  %v418_v51 = vld [vmem:[%s5137_s1 + $0xba0] sm:$0xff]  ;;  %v481_v15 = vld [vmem:[%s5137_s1 + $0xd98] sm:$0xff] }
  0xa7   :  { %2569 = vmatpush1.bf16.msra.mxu1 %v2568_v52  ;;  %2315 = vmatprep.subr.bf16.mxu0 %v2314_v53  ;;  %v416_v52 = vld [vmem:[%s5137_s1 + $0xb90] sm:$0xff]  ;;  %v2590_v53 = vpack.c.bf16 %v421_v46, %v417_v45  ;;  %v2336_v59 = vpack.c.bf16 %v418_v51, %v414_v50  ;;  %v2608_v46 = vpack.c.bf16 %v452_v40, %v448_v38  ;;  %v485_v16 = vld [vmem:[%s5137_s1 + $0xdb8] sm:$0xff]  ;;  %v499_v38 = vld [vmem:[%s5137_s1 + $0xe28] sm:$0xff] }
  0xa8   :  { %2571 = vmatprep.subr.bf16.mxu1 %v2570_v57  ;;  %v425_v57 = vld [vmem:[%s5137_s1 + $0xbd8] sm:$0xff]  ;;  %v2592_v60 = vpack.c.bf16 %v420_v54, %v416_v52  ;;  %v456_v50 = vld [vmem:[%s5137_s1 + $0xcd0] sm:$0xff]  ;;  %v2610_v51 = vpack.c.bf16 %v461_v44, %v457_v43  ;;  %v467_v54 = vld [vmem:[%s5137_s1 + $0xd28] sm:$0xff] }
  0xa9   :  { %v460_v52 = vld [vmem:[%s5137_s1 + $0xcf0] sm:$0xff]  ;;  %v501_v40 = vld [vmem:[%s5137_s1 + $0xe38] sm:$0xff]  ;;  %v494_v44 = vld [vmem:[%s5137_s1 + $0xe00] sm:$0xff] }
  0xaa   :  { %2317 = vmatpush1.bf16.msra.mxu0 %v2316_v63  ;;  %v426_v63 = vld [vmem:[%s5137_s1 + $0xbe0] sm:$0xff] }
  0xab   :  { %2573 = vmatpush1.bf16.msra.mxu1 %v2572_v0  ;;  %2319 = vmatprep.subr.bf16.mxu0 %v2318_v1  ;;  %v424_v0 = vld [vmem:[%s5137_s1 + $0xbd0] sm:$0xff]  ;;  %v2594_v1 = vpack.c.bf16 %v429_v58, %v425_v57  ;;  %v2340_v7 = vpack.c.bf16 %v426_v63, %v422_v62  ;;  %v2612_v58 = vpack.c.bf16 %v460_v52, %v456_v50  ;;  %v507_v50 = vld [vmem:[%s5137_s1 + $0xe68] sm:$0xff]  ;;  %v509_v52 = vld [vmem:[%s5137_s1 + $0xe78] sm:$0xff] }
  0xac   :  { %2575 = vmatprep.subr.bf16.mxu1 %v2574_v5  ;;  %v433_v5 = vld [vmem:[%s5137_s1 + $0xc18] sm:$0xff]  ;;  %v2596_v8 = vpack.c.bf16 %v428_v2, %v424_v0  ;;  %v464_v62 = vld [vmem:[%s5137_s1 + $0xd10] sm:$0xff]  ;;  %v2614_v63 = vpack.c.bf16 %v469_v56, %v465_v55  ;;  %v475_v2 = vld [vmem:[%s5137_s1 + $0xd68] sm:$0xff] }
  0xad   :  { %v468_v0 = vld [vmem:[%s5137_s1 + $0xd30] sm:$0xff]  ;;  %v502_v56 = vld [vmem:[%s5137_s1 + $0xe40] sm:$0xff] }
  0xae   :  { %2321 = vmatpush1.bf16.msra.mxu0 %v2320_v11  ;;  %v434_v11 = vld [vmem:[%s5137_s1 + $0xc20] sm:$0xff] }
  0xaf   :  { %2577 = vmatpush1.bf16.msra.mxu1 %v2576_v12  ;;  %2323 = vmatprep.subr.bf16.mxu0 %v2322_v13  ;;  %v432_v12 = vld [vmem:[%s5137_s1 + $0xc10] sm:$0xff]  ;;  %v2598_v13 = vpack.c.bf16 %v437_v6, %v433_v5  ;;  %v2344_v20 = vpack.c.bf16 %v434_v11, %v430_v10  ;;  %v2616_v6 = vpack.c.bf16 %v468_v0, %v464_v62  ;;  %v515_v62 = vld [vmem:[%s5137_s1 + $0xea8] sm:$0xff]  ;;  %v517_v0 = vld [vmem:[%s5137_s1 + $0xeb8] sm:$0xff] }
  0xb0   :  { %2579 = vmatprep.subr.bf16.mxu1 %v2578_v17  ;;  %v441_v17 = vld [vmem:[%s5137_s1 + $0xc58] sm:$0xff]  ;;  %v2600_v21 = vpack.c.bf16 %v436_v14, %v432_v12  ;;  %v472_v10 = vld [vmem:[%s5137_s1 + $0xd50] sm:$0xff]  ;;  %v2618_v11 = vpack.c.bf16 %v477_v4, %v473_v3  ;;  %v483_v14 = vld [vmem:[%s5137_s1 + $0xda8] sm:$0xff] }
  0xb1   :  { %v2602_v26 = vpack.c.bf16 %v445_v18, %v441_v17  ;;  %v476_v12 = vld [vmem:[%s5137_s1 + $0xd70] sm:$0xff]  ;;  %v510_v4 = vld [vmem:[%s5137_s1 + $0xe80] sm:$0xff] }
  0xb2   :  { %2325 = vmatpush1.bf16.msra.mxu0 %v2324_v23  ;;  %v438_v23 = vld [vmem:[%s5137_s1 + $0xc40] sm:$0xff]  ;;  %v2620_v18 = vpack.c.bf16 %v476_v12, %v472_v10  ;;  %v523_v10 = vld [vmem:[%s5137_s1 + $0xee8] sm:$0xff]  ;;  %v525_v12 = vld [vmem:[%s5137_s1 + $0xef8] sm:$0xff] }
  0xb3   :  { %2581 = vmatpush1.bf16.msra.mxu1 %v2580_v24  ;;  %2327 = vmatprep.subr.bf16.mxu0 %v2326_v25  ;;  %v442_v24 = vld [vmem:[%s5137_s1 + $0xc60] sm:$0xff]  ;;  %v440_v25 = vld [vmem:[%s5137_s1 + $0xc50] sm:$0xff] }
  0xb4   :  { %2583 = vmatprep.subr.bf16.mxu1 %v2582_v29  ;;  %v451_v29 = vld [vmem:[%s5137_s1 + $0xca8] sm:$0xff]  ;;  %v2348_v33 = vpack.c.bf16 %v442_v24, %v438_v23  ;;  %v2604_v34 = vpack.c.bf16 %v444_v27, %v440_v25  ;;  %v2622_v23 = vpack.c.bf16 %v485_v16, %v481_v15  ;;  %v484_v24 = vld [vmem:[%s5137_s1 + $0xdb0] sm:$0xff]  ;;  %v489_v27 = vld [vmem:[%s5137_s1 + $0xdd8] sm:$0xff] }
  0xb5   :  { %v487_v25 = vld [vmem:[%s5137_s1 + $0xdc8] sm:$0xff]  ;;  %v518_v16 = vld [vmem:[%s5137_s1 + $0xec0] sm:$0xff] }
  0xb6   :  { %2329 = vmatpush1.bf16.msra.mxu0 %v2328_v35  ;;  %v2350_v35 = vpack.c.bf16 %v451_v29, %v447_v28  ;;  %v493_v28 = vld [vmem:[%s5137_s1 + $0xdf8] sm:$0xff] }
  0xb7   :  { %2585 = vmatpush1.bf16.msra.mxu1 %v2584_v36  ;;  %2331 = vmatprep.subr.bf16.mxu0 %v2330_v37  ;;  %v446_v36 = vld [vmem:[%s5137_s1 + $0xc80] sm:$0xff] }
  0xb8   :  { %2587 = vmatprep.subr.bf16.mxu1 %v2586_v41  ;;  %v450_v37 = vld [vmem:[%s5137_s1 + $0xca0] sm:$0xff]  ;;  %v455_v41 = vld [vmem:[%s5137_s1 + $0xcc8] sm:$0xff] }
  0xb9   :  { %v2352_v45 = vpack.c.bf16 %v450_v37, %v446_v36  ;;  %v492_v36 = vld [vmem:[%s5137_s1 + $0xdf0] sm:$0xff]  ;;  %v495_v37 = vld [vmem:[%s5137_s1 + $0xe08] sm:$0xff] }
  0xba   :  { %2333 = vmatpush1.bf16.msra.mxu0 %v2332_v47  ;;  %v2354_v47 = vpack.c.bf16 %v459_v42, %v455_v41  ;;  %v2374_v43 = vpack.c.bf16 %v499_v38, %v495_v37 }
  0xbb   :  { %2589 = vmatpush1.bf16.msra.mxu1 %v2588_v48  ;;  %2335 = vmatprep.subr.bf16.mxu0 %v2334_v49  ;;  %v454_v48 = vld [vmem:[%s5137_s1 + $0xcc0] sm:$0xff] }
  0xbc   :  { %2591 = vmatprep.subr.bf16.mxu1 %v2590_v53  ;;  %v458_v49 = vld [vmem:[%s5137_s1 + $0xce0] sm:$0xff]  ;;  %v463_v53 = vld [vmem:[%s5137_s1 + $0xd08] sm:$0xff] }
  0xbd   :  { %v2356_v57 = vpack.c.bf16 %v458_v49, %v454_v48  ;;  %v500_v48 = vld [vmem:[%s5137_s1 + $0xe30] sm:$0xff]  ;;  %v503_v49 = vld [vmem:[%s5137_s1 + $0xe48] sm:$0xff] }
  0xbe   :  { %2337 = vmatpush1.bf16.msra.mxu0 %v2336_v59  ;;  %v2358_v59 = vpack.c.bf16 %v467_v54, %v463_v53  ;;  %v2378_v55 = vpack.c.bf16 %v507_v50, %v503_v49 }
  0xbf   :  { %2593 = vmatpush1.bf16.msra.mxu1 %v2592_v60  ;;  %2339 = vmatprep.subr.bf16.mxu0 %v2338_v61  ;;  %v462_v60 = vld [vmem:[%s5137_s1 + $0xd00] sm:$0xff] }
  0xc0   :  { %2595 = vmatprep.subr.bf16.mxu1 %v2594_v1  ;;  %v466_v61 = vld [vmem:[%s5137_s1 + $0xd20] sm:$0xff]  ;;  %v471_v1 = vld [vmem:[%s5137_s1 + $0xd48] sm:$0xff] }
  0xc1   :  { %v2360_v5 = vpack.c.bf16 %v466_v61, %v462_v60  ;;  %v508_v60 = vld [vmem:[%s5137_s1 + $0xe70] sm:$0xff]  ;;  %v511_v61 = vld [vmem:[%s5137_s1 + $0xe88] sm:$0xff] }
  0xc2   :  { %2341 = vmatpush1.bf16.msra.mxu0 %v2340_v7  ;;  %v2362_v7 = vpack.c.bf16 %v475_v2, %v471_v1  ;;  %v2382_v3 = vpack.c.bf16 %v515_v62, %v511_v61 }
  0xc3   :  { %2597 = vmatpush1.bf16.msra.mxu1 %v2596_v8  ;;  %2343 = vmatprep.subr.bf16.mxu0 %v2342_v9  ;;  %v470_v8 = vld [vmem:[%s5137_s1 + $0xd40] sm:$0xff] }
  0xc4   :  { %2599 = vmatprep.subr.bf16.mxu1 %v2598_v13  ;;  %v474_v9 = vld [vmem:[%s5137_s1 + $0xd60] sm:$0xff]  ;;  %v479_v13 = vld [vmem:[%s5137_s1 + $0xd88] sm:$0xff] }
  0xc5   :  { %787 = vmatmul.mubr.f32.vlgmr.msra.gmra.mrb[0].mxu0 %v42_v19  ;;  %v2364_v17 = vpack.c.bf16 %v474_v9, %v470_v8  ;;  %v516_v8 = vld [vmem:[%s5137_s1 + $0xeb0] sm:$0xff]  ;;  %v519_v9 = vld [vmem:[%s5137_s1 + $0xec8] sm:$0xff] }
  0xc6   :  { %2345 = vmatpush1.bf16.msra.mxu0 %v2344_v20  ;;  %1071 = vmatmul.mubr.f32.vlgmr.msra.gmra.mrb[0].mxu1 %v42_v19  ;;  %v2366_v19 = vpack.c.bf16 %v483_v14, %v479_v13  ;;  %v478_v20 = vld [vmem:[%s5137_s1 + $0xd80] sm:$0xff]  ;;  %v2386_v15 = vpack.c.bf16 %v523_v10, %v519_v9 }
  0xc7   :  { %2601 = vmatpush1.bf16.msra.mxu1 %v2600_v21  ;;  %2347 = vmatprep.subr.bf16.mxu0 %v2346_v22  ;;  %v482_v21 = vld [vmem:[%s5137_s1 + $0xda0] sm:$0xff]  ;;  %v480_v22 = vld [vmem:[%s5137_s1 + $0xd90] sm:$0xff] }
  0xc8   :  { %2603 = vmatprep.subr.bf16.mxu1 %v2602_v26  ;;  %857 = vmatprep.mubr.f32.mxu0 %v45_v32  ;;  %v491_v26 = vld [vmem:[%s5137_s1 + $0xde8] sm:$0xff]  ;;  %v2368_v29 = vpack.c.bf16 %v482_v21, %v478_v20  ;;  %v2624_v30 = vpack.c.bf16 %v484_v24, %v480_v22  ;;  %v524_v20 = vld [vmem:[%s5137_s1 + $0xef0] sm:$0xff]  ;;  %v533_v24 = vld [vmem:[%s5137_s1 + $0xf38] sm:$0xff] }
  0xc9   :  { %1141 = vmatprep.mubr.f32.mxu1 %v45_v32  ;;  %v2370_v31 = vpack.c.bf16 %v491_v26, %v487_v25  ;;  %v486_v32 = vld [vmem:[%s5137_s1 + $0xdc0] sm:$0xff]  ;;  %v527_v21 = vld [vmem:[%s5137_s1 + $0xf08] sm:$0xff] }
  0xca   :  { %2349 = vmatpush1.bf16.msra.mxu0 %v2348_v33  ;;  %v490_v33 = vld [vmem:[%s5137_s1 + $0xde0] sm:$0xff]  ;;  %v531_v22 = vld [vmem:[%s5137_s1 + $0xf28] sm:$0xff] }
  0xcb   :  { %2605 = vmatpush1.bf16.msra.mxu1 %v2604_v34  ;;  %2351 = vmatprep.subr.bf16.mxu0 %v2350_v35  ;;  %v488_v34 = vld [vmem:[%s5137_s1 + $0xdd0] sm:$0xff]  ;;  %v2626_v35 = vpack.c.bf16 %v493_v28, %v489_v27  ;;  %v2372_v41 = vpack.c.bf16 %v490_v33, %v486_v32  ;;  %v2390_v27 = vpack.c.bf16 %v531_v22, %v527_v21  ;;  %v526_v28 = vld [vmem:[%s5137_s1 + $0xf00] sm:$0xff]  ;;  %v535_v33 = vld [vmem:[%s5137_s1 + $0xf48] sm:$0xff] }
  0xcc   :  { %2607 = vmatprep.subr.bf16.mxu1 %v2606_v39  ;;  %v497_v39 = vld [vmem:[%s5137_s1 + $0xe18] sm:$0xff]  ;;  %v2628_v42 = vpack.c.bf16 %v492_v36, %v488_v34  ;;  %v532_v32 = vld [vmem:[%s5137_s1 + $0xf30] sm:$0xff]  ;;  %v539_v34 = vld [vmem:[%s5137_s1 + $0xf68] sm:$0xff] }
  0xcd   :  { %v541_v36 = vld [vmem:[%s5137_s1 + $0xf78] sm:$0xff]  ;;  %v44_v21 = vld [vmem:[%s5138_s0 + $0x30] sm:$0xff] }
  0xce   :  { %2353 = vmatpush1.bf16.msra.mxu0 %v2352_v45  ;;  %v498_v45 = vld [vmem:[%s5137_s1 + $0xe20] sm:$0xff] }
  0xcf   :  { %2609 = vmatpush1.bf16.msra.mxu1 %v2608_v46  ;;  %2355 = vmatprep.subr.bf16.mxu0 %v2354_v47  ;;  %v496_v46 = vld [vmem:[%s5137_s1 + $0xe10] sm:$0xff]  ;;  %v2630_v47 = vpack.c.bf16 %v501_v40, %v497_v39  ;;  %v2376_v53 = vpack.c.bf16 %v498_v45, %v494_v44  ;;  %v2394_v39 = vpack.c.bf16 %v539_v34, %v535_v33  ;;  %v534_v40 = vld [vmem:[%s5137_s1 + $0xf40] sm:$0xff]  ;;  %v543_v45 = vld [vmem:[%s5137_s1 + $0xf88] sm:$0xff] }
  0xd0   :  { %2611 = vmatprep.subr.bf16.mxu1 %v2610_v51  ;;  %v505_v51 = vld [vmem:[%s5137_s1 + $0xe58] sm:$0xff]  ;;  %v2632_v54 = vpack.c.bf16 %v500_v48, %v496_v46  ;;  %v540_v44 = vld [vmem:[%s5137_s1 + $0xf70] sm:$0xff]  ;;  %v547_v46 = vld [vmem:[%s5137_s1 + $0xfa8] sm:$0xff] }
  0xd1   :  { %v549_v48 = vld [vmem:[%s5137_s1 + $0xfb8] sm:$0xff]  ;;  %v1213_v33 = vld [vmem:[%s5139_s3 + $0x1a8] sm:$0xff] }
  0xd2   :  { %2357 = vmatpush1.bf16.msra.mxu0 %v2356_v57  ;;  %v506_v57 = vld [vmem:[%s5137_s1 + $0xe60] sm:$0xff] }
  0xd3   :  { %2613 = vmatpush1.bf16.msra.mxu1 %v2612_v58  ;;  %2359 = vmatprep.subr.bf16.mxu0 %v2358_v59  ;;  %v504_v58 = vld [vmem:[%s5137_s1 + $0xe50] sm:$0xff]  ;;  %v2634_v59 = vpack.c.bf16 %v509_v52, %v505_v51  ;;  %v2380_v1 = vpack.c.bf16 %v506_v57, %v502_v56  ;;  %v2398_v51 = vpack.c.bf16 %v547_v46, %v543_v45  ;;  %v542_v52 = vld [vmem:[%s5137_s1 + $0xf80] sm:$0xff]  ;;  %v551_v57 = vld [vmem:[%s5137_s1 + $0xfc8] sm:$0xff] }
  0xd4   :  { %2615 = vmatprep.subr.bf16.mxu1 %v2614_v63  ;;  %v513_v63 = vld [vmem:[%s5137_s1 + $0xe98] sm:$0xff]  ;;  %v2636_v2 = vpack.c.bf16 %v508_v60, %v504_v58  ;;  %v548_v56 = vld [vmem:[%s5137_s1 + $0xfb0] sm:$0xff]  ;;  %v555_v58 = vld [vmem:[%s5137_s1 + $0xfe8] sm:$0xff] }
  0xd5   :  { %v557_v60 = vld [vmem:[%s5137_s1 + $0xff8] sm:$0xff] }
  0xd6   :  { %2361 = vmatpush1.bf16.msra.mxu0 %v2360_v5  ;;  %v514_v5 = vld [vmem:[%s5137_s1 + $0xea0] sm:$0xff]  ;;  %v1215_v45 = vld [vmem:[%s5139_s3 + $0x1b8] sm:$0xff] }
  0xd7   :  { %2617 = vmatpush1.bf16.msra.mxu1 %v2616_v6  ;;  %2363 = vmatprep.subr.bf16.mxu0 %v2362_v7  ;;  %v512_v6 = vld [vmem:[%s5137_s1 + $0xe90] sm:$0xff]  ;;  %v2638_v7 = vpack.c.bf16 %v517_v0, %v513_v63  ;;  %v2384_v13 = vpack.c.bf16 %v514_v5, %v510_v4  ;;  %v2402_v63 = vpack.c.bf16 %v555_v58, %v551_v57  ;;  %v550_v0 = vld [vmem:[%s5137_s1 + $0xfc0] sm:$0xff]  ;;  %v1217_v57 = vld [vmem:[%s5139_s3 + $0x1c8] sm:$0xff] }
  0xd8   :  { %2619 = vmatprep.subr.bf16.mxu1 %v2618_v11  ;;  %v521_v11 = vld [vmem:[%s5137_s1 + $0xed8] sm:$0xff]  ;;  %v2640_v14 = vpack.c.bf16 %v516_v8, %v512_v6  ;;  %v556_v4 = vld [vmem:[%s5137_s1 + $0xff0] sm:$0xff]  ;;  %v1176_v5 = vld [vmem:[%s5139_s3 + $0x80] sm:$0xff] }
  0xd9   :  { %v1177_v6 = vld [vmem:[%s5139_s3 + $0x88] sm:$0xff] }
  0xda   :  { %2365 = vmatpush1.bf16.msra.mxu0 %v2364_v17  ;;  %v522_v17 = vld [vmem:[%s5137_s1 + $0xee0] sm:$0xff]  ;;  %v1209_v8 = vld [vmem:[%s5139_s3 + $0x188] sm:$0xff] }
  0xdb   :  { %2621 = vmatpush1.bf16.msra.mxu1 %v2620_v18  ;;  %2367 = vmatprep.subr.bf16.mxu0 %v2366_v19  ;;  %v520_v18 = vld [vmem:[%s5137_s1 + $0xed0] sm:$0xff]  ;;  %v2642_v19 = vpack.c.bf16 %v525_v12, %v521_v11  ;;  %v2388_v25 = vpack.c.bf16 %v522_v17, %v518_v16  ;;  %v2662_v11 = vpack.c.bf16 %v1177_v6, %v1176_v5  ;;  %v1160_v12 = vld [vmem:[%s5139_s3] sm:$0xff]  ;;  %v1193_v16 = vld [vmem:[%s5139_s3 + $0x108] sm:$0xff] }
  0xdc   :  { %2623 = vmatprep.subr.bf16.mxu1 %v2622_v23  ;;  %v529_v23 = vld [vmem:[%s5137_s1 + $0xf18] sm:$0xff]  ;;  %v2644_v26 = vpack.c.bf16 %v524_v20, %v520_v18  ;;  %v1178_v17 = vld [vmem:[%s5139_s3 + $0x90] sm:$0xff] }
  0xdd   :  { %v1179_v18 = vld [vmem:[%s5139_s3 + $0x98] sm:$0xff] }
  0xde   :  { %2369 = vmatpush1.bf16.msra.mxu0 %v2368_v29  ;;  %v530_v29 = vld [vmem:[%s5137_s1 + $0xf20] sm:$0xff]  ;;  %v1211_v20 = vld [vmem:[%s5139_s3 + $0x198] sm:$0xff] }
  0xdf   :  { %2625 = vmatpush1.bf16.msra.mxu1 %v2624_v30  ;;  %2371 = vmatprep.subr.bf16.mxu0 %v2370_v31  ;;  %v528_v30 = vld [vmem:[%s5137_s1 + $0xf10] sm:$0xff]  ;;  %v2646_v31 = vpack.c.bf16 %v533_v24, %v529_v23  ;;  %v2392_v37 = vpack.c.bf16 %v530_v29, %v526_v28  ;;  %v2666_v24 = vpack.c.bf16 %v1179_v18, %v1178_v17  ;;  %v1195_v29 = vld [vmem:[%s5139_s3 + $0x118] sm:$0xff]  ;;  %v1221_v17 = vld [vmem:[%s5139_s3 + $0x1e8] sm:$0xff] }
  0xe0   :  { %2627 = vmatprep.subr.bf16.mxu1 %v2626_v35  ;;  %v537_v35 = vld [vmem:[%s5137_s1 + $0xf58] sm:$0xff]  ;;  %v2648_v38 = vpack.c.bf16 %v532_v32, %v528_v30  ;;  %v1180_v30 = vld [vmem:[%s5139_s3 + $0xa0] sm:$0xff] }
  0xe1   :  { %v1212_v32 = vld [vmem:[%s5139_s3 + $0x1a0] sm:$0xff]  ;;  %v1219_v5 = vld [vmem:[%s5139_s3 + $0x1d8] sm:$0xff] }
  0xe2   :  { %2373 = vmatpush1.bf16.msra.mxu0 %v2372_v41  ;;  %v538_v41 = vld [vmem:[%s5137_s1 + $0xf60] sm:$0xff] }
  0xe3   :  { %2629 = vmatpush1.bf16.msra.mxu1 %v2628_v42  ;;  %2375 = vmatprep.subr.bf16.mxu0 %v2374_v43  ;;  %v536_v42 = vld [vmem:[%s5137_s1 + $0xf50] sm:$0xff]  ;;  %v2650_v43 = vpack.c.bf16 %v541_v36, %v537_v35  ;;  %v2396_v49 = vpack.c.bf16 %v538_v41, %v534_v40  ;;  %v2702_v40 = vpack.c.bf16 %v1213_v33, %v1212_v32  ;;  %v1197_v41 = vld [vmem:[%s5139_s3 + $0x128] sm:$0xff]  ;;  %v1223_v32 = vld [vmem:[%s5139_s3 + $0x1f8] sm:$0xff] }
  0xe4   :  { %2631 = vmatprep.subr.bf16.mxu1 %v2630_v47  ;;  %v545_v47 = vld [vmem:[%s5137_s1 + $0xf98] sm:$0xff]  ;;  %v2652_v50 = vpack.c.bf16 %v540_v44, %v536_v42  ;;  %v1182_v42 = vld [vmem:[%s5139_s3 + $0xb0] sm:$0xff] }
  0xe5   :  { %v1214_v44 = vld [vmem:[%s5139_s3 + $0x1b0] sm:$0xff] }
  0xe6   :  { %2377 = vmatpush1.bf16.msra.mxu0 %v2376_v53  ;;  %v546_v53 = vld [vmem:[%s5137_s1 + $0xfa0] sm:$0xff]  ;;  %v1174_v33 = vld [vmem:[%s5139_s3 + $0x70] sm:$0xff] }
  0xe7   :  { %2633 = vmatpush1.bf16.msra.mxu1 %v2632_v54  ;;  %2379 = vmatprep.subr.bf16.mxu0 %v2378_v55  ;;  %v544_v54 = vld [vmem:[%s5137_s1 + $0xf90] sm:$0xff]  ;;  %v2654_v55 = vpack.c.bf16 %v549_v48, %v545_v47  ;;  %v2400_v61 = vpack.c.bf16 %v546_v53, %v542_v52  ;;  %v2706_v52 = vpack.c.bf16 %v1215_v45, %v1214_v44  ;;  %v1199_v53 = vld [vmem:[%s5139_s3 + $0x138] sm:$0xff]  ;;  %v1273_v44 = vld [vmem:[%s5139_s3 + $0x388] sm:$0xff] }
  0xe8   :  { %2635 = vmatprep.subr.bf16.mxu1 %v2634_v59  ;;  %v553_v59 = vld [vmem:[%s5137_s1 + $0xfd8] sm:$0xff]  ;;  %v2656_v62 = vpack.c.bf16 %v548_v56, %v544_v54  ;;  %v1184_v54 = vld [vmem:[%s5139_s3 + $0xc0] sm:$0xff] }
  0xe9   :  { %v1216_v56 = vld [vmem:[%s5139_s3 + $0x1c0] sm:$0xff] }
  0xea   :  { %2381 = vmatpush1.bf16.msra.mxu0 %v2380_v1  ;;  %v554_v1 = vld [vmem:[%s5137_s1 + $0xfe0] sm:$0xff] }
  0xeb   :  { %2637 = vmatpush1.bf16.msra.mxu1 %v2636_v2  ;;  %2383 = vmatprep.subr.bf16.mxu0 %v2382_v3  ;;  %v552_v2 = vld [vmem:[%s5137_s1 + $0xfd0] sm:$0xff]  ;;  %v2658_v3 = vpack.c.bf16 %v557_v60, %v553_v59  ;;  %v2404_v9 = vpack.c.bf16 %v554_v1, %v550_v0  ;;  %v2710_v0 = vpack.c.bf16 %v1217_v57, %v1216_v56  ;;  %v1201_v1 = vld [vmem:[%s5139_s3 + $0x148] sm:$0xff] }
  0xec   :  { %2639 = vmatprep.subr.bf16.mxu1 %v2638_v7  ;;  %v1208_v7 = vld [vmem:[%s5139_s3 + $0x180] sm:$0xff]  ;;  %v2660_v10 = vpack.c.bf16 %v556_v4, %v552_v2  ;;  %v1186_v2 = vld [vmem:[%s5139_s3 + $0xd0] sm:$0xff] }
  0xed   :  { %v1218_v4 = vld [vmem:[%s5139_s3 + $0x1d0] sm:$0xff] }
  0xee   :  { %2385 = vmatpush1.bf16.msra.mxu0 %v2384_v13  ;;  %v1161_v13 = vld [vmem:[%s5139_s3 + $0x8] sm:$0xff] }
  0xef   :  { %2641 = vmatpush1.bf16.msra.mxu1 %v2640_v14  ;;  %2387 = vmatprep.subr.bf16.mxu0 %v2386_v15  ;;  %v1192_v14 = vld [vmem:[%s5139_s3 + $0x100] sm:$0xff]  ;;  %v2694_v15 = vpack.c.bf16 %v1209_v8, %v1208_v7  ;;  %v2664_v22 = vpack.c.bf16 %v1161_v13, %v1160_v12  ;;  %v2714_v12 = vpack.c.bf16 %v1219_v5, %v1218_v4  ;;  %v1203_v13 = vld [vmem:[%s5139_s3 + $0x158] sm:$0xff]  ;;  %v1242_v5 = vld [vmem:[%s5139_s3 + $0x290] sm:$0xff] }
  0xf0   :  { %2643 = vmatprep.subr.bf16.mxu1 %v2642_v19  ;;  %v1210_v19 = vld [vmem:[%s5139_s3 + $0x190] sm:$0xff]  ;;  %v2696_v23 = vpack.c.bf16 %v1193_v16, %v1192_v14  ;;  %v1188_v14 = vld [vmem:[%s5139_s3 + $0xe0] sm:$0xff] }
  0xf1   :  { %v2698_v28 = vpack.c.bf16 %v1211_v20, %v1210_v19  ;;  %v1220_v16 = vld [vmem:[%s5139_s3 + $0x1e0] sm:$0xff] }
  0xf2   :  { %2389 = vmatpush1.bf16.msra.mxu0 %v2388_v25  ;;  %v1162_v25 = vld [vmem:[%s5139_s3 + $0x10] sm:$0xff] }
  0xf3   :  { %2645 = vmatpush1.bf16.msra.mxu1 %v2644_v26  ;;  %2391 = vmatprep.subr.bf16.mxu0 %v2390_v27  ;;  %v1163_v26 = vld [vmem:[%s5139_s3 + $0x18] sm:$0xff]  ;;  %v1194_v27 = vld [vmem:[%s5139_s3 + $0x110] sm:$0xff] }
  0xf4   :  { %2647 = vmatprep.subr.bf16.mxu1 %v2646_v31  ;;  %v1181_v31 = vld [vmem:[%s5139_s3 + $0xa8] sm:$0xff]  ;;  %v2668_v34 = vpack.c.bf16 %v1163_v26, %v1162_v25  ;;  %v2700_v35 = vpack.c.bf16 %v1195_v29, %v1194_v27  ;;  %v1191_v29 = vld [vmem:[%s5139_s3 + $0xf8] sm:$0xff] }
  0xf5   :  { %v2670_v36 = vpack.c.bf16 %v1181_v31, %v1180_v30  ;;  %v1205_v25 = vld [vmem:[%s5139_s3 + $0x168] sm:$0xff]  ;;  %v1222_v30 = vld [vmem:[%s5139_s3 + $0x1f0] sm:$0xff] }
  0xf6   :  { %2393 = vmatpush1.bf16.msra.mxu0 %v2392_v37  ;;  %v1164_v37 = vld [vmem:[%s5139_s3 + $0x20] sm:$0xff] }
  0xf7   :  { %2649 = vmatpush1.bf16.msra.mxu1 %v2648_v38  ;;  %2395 = vmatprep.subr.bf16.mxu0 %v2394_v39  ;;  %v1165_v38 = vld [vmem:[%s5139_s3 + $0x28] sm:$0xff]  ;;  %v1196_v39 = vld [vmem:[%s5139_s3 + $0x120] sm:$0xff] }
  0xf8   :  { %2651 = vmatprep.subr.bf16.mxu1 %v2650_v43  ;;  %v1183_v43 = vld [vmem:[%s5139_s3 + $0xb8] sm:$0xff]  ;;  %v2672_v46 = vpack.c.bf16 %v1165_v38, %v1164_v37  ;;  %v2704_v47 = vpack.c.bf16 %v1197_v41, %v1196_v39  ;;  %v1206_v37 = vld [vmem:[%s5139_s3 + $0x170] sm:$0xff]  ;;  %v1241_v41 = vld [vmem:[%s5139_s3 + $0x288] sm:$0xff] }
  0xf9   :  { %v2674_v48 = vpack.c.bf16 %v1183_v43, %v1182_v42  ;;  %v1207_v38 = vld [vmem:[%s5139_s3 + $0x178] sm:$0xff]  ;;  %v1272_v42 = vld [vmem:[%s5139_s3 + $0x380] sm:$0xff] }
  0xfa   :  { %2397 = vmatpush1.bf16.msra.mxu0 %v2396_v49  ;;  %v1166_v49 = vld [vmem:[%s5139_s3 + $0x30] sm:$0xff]  ;;  %v2724_v39 = vpack.c.bf16 %v1207_v38, %v1206_v37  ;;  %v2758_v45 = vpack.c.bf16 %v1273_v44, %v1272_v42  ;;  %v1247_v38 = vld [vmem:[%s5139_s3 + $0x2b8] sm:$0xff] }
  0xfb   :  { %2653 = vmatpush1.bf16.msra.mxu1 %v2652_v50  ;;  %2399 = vmatprep.subr.bf16.mxu0 %v2398_v51  ;;  %v1167_v50 = vld [vmem:[%s5139_s3 + $0x38] sm:$0xff]  ;;  %v1198_v51 = vld [vmem:[%s5139_s3 + $0x130] sm:$0xff] }
  0xfc   :  { %2655 = vmatprep.subr.bf16.mxu1 %v2654_v55  ;;  %v1185_v55 = vld [vmem:[%s5139_s3 + $0xc8] sm:$0xff]  ;;  %v2676_v58 = vpack.c.bf16 %v1167_v50, %v1166_v49  ;;  %v2708_v59 = vpack.c.bf16 %v1199_v53, %v1198_v51  ;;  %v558_v49 = vld [vmem:[%s5140_s2] sm:$0xf]  ;;  %v1246_v37 = vld [vmem:[%s5139_s3 + $0x2b0] sm:$0xff] }
  0xfd   :  { %v2678_v60 = vpack.c.bf16 %v1185_v55, %v1184_v54  ;;  %v1230_v44 = vld [vmem:[%s5139_s3 + $0x230] sm:$0xff] }
  0xfe   :  { %2401 = vmatpush1.bf16.msra.mxu0 %v2400_v61  ;;  %v1168_v61 = vld [vmem:[%s5139_s3 + $0x40] sm:$0xff] }
  0xff   :  { %2657 = vmatpush1.bf16.msra.mxu1 %v2656_v62  ;;  %2403 = vmatprep.subr.bf16.mxu0 %v2402_v63  ;;  %v1169_v62 = vld [vmem:[%s5139_s3 + $0x48] sm:$0xff]  ;;  %v1200_v63 = vld [vmem:[%s5139_s3 + $0x140] sm:$0xff] }
 0x100   :  { %2659 = vmatprep.subr.bf16.mxu1 %v2658_v3  ;;  %v1187_v3 = vld [vmem:[%s5139_s3 + $0xd8] sm:$0xff]  ;;  %v2680_v6 = vpack.c.bf16 %v1169_v62, %v1168_v61  ;;  %v2712_v7 = vpack.c.bf16 %v1201_v1, %v1200_v63  ;;  %v1224_v61 = vld [vmem:[%s5139_s3 + $0x200] sm:$0xff]  ;;  %v1225_v62 = vld [vmem:[%s5139_s3 + $0x208] sm:$0xff] }
 0x101   :  { %v2682_v8 = vpack.c.bf16 %v1187_v3, %v1186_v2  ;;  %v1256_v2 = vld [vmem:[%s5139_s3 + $0x300] sm:$0xff]  ;;  %v1257_v3 = vld [vmem:[%s5139_s3 + $0x308] sm:$0xff] }
 0x102   :  { %2405 = vmatpush1.bf16.msra.mxu0 %v2404_v9  ;;  %v1170_v9 = vld [vmem:[%s5139_s3 + $0x50] sm:$0xff] }
 0x103   :  { %2661 = vmatpush1.bf16.msra.mxu1 %v2660_v10  ;;  %2663 = vmatprep.subr.bf16.mxu0 %v2662_v11  ;;  %v1171_v10 = vld [vmem:[%s5139_s3 + $0x58] sm:$0xff]  ;;  %v1202_v11 = vld [vmem:[%s5139_s3 + $0x150] sm:$0xff] }
 0x104   :  { %2695 = vmatprep.subr.bf16.mxu1 %v2694_v15  ;;  %v1189_v15 = vld [vmem:[%s5139_s3 + $0xe8] sm:$0xff]  ;;  %v2684_v18 = vpack.c.bf16 %v1171_v10, %v1170_v9  ;;  %v2716_v19 = vpack.c.bf16 %v1203_v13, %v1202_v11  ;;  %v2728_v9 = vpack.c.bf16 %v1225_v62, %v1224_v61  ;;  %v1274_v10 = vld [vmem:[%s5139_s3 + $0x390] sm:$0xff]  ;;  %v1275_v11 = vld [vmem:[%s5139_s3 + $0x398] sm:$0xff] }
 0x105   :  { %858 = vmatmul.mubr.f32.vlgmr.msra.gmra.mrb[0].mxu0 %v44_v21  ;;  %v2686_v20 = vpack.c.bf16 %v1189_v15, %v1188_v14  ;;  %v2760_v15 = vpack.c.bf16 %v1257_v3, %v1256_v2  ;;  %v1265_v61 = vld [vmem:[%s5139_s3 + $0x348] sm:$0xff]  ;;  %v1250_v62 = vld [vmem:[%s5139_s3 + $0x2d0] sm:$0xff]  ;;  %v1283_v2 = vld [vmem:[%s5139_s3 + $0x3d8] sm:$0xff] }
 0x106   :  { %1142 = vmatmul.mubr.f32.vlgmr.msra.gmra.mrb[0].mxu1 %v44_v21  ;;  %2665 = vmatpush3.bf16.msra.mxu0 %v2664_v22  ;;  %v1172_v21 = vld [vmem:[%s5139_s3 + $0x60] sm:$0xff]  ;;  %v1173_v22 = vld [vmem:[%s5139_s3 + $0x68] sm:$0xff] }
 0x107   :  { %2697 = vmatpush3.bf16.msra.mxu1 %v2696_v23  ;;  %2667 = vmatprep.subr.bf16.mxu0 %v2666_v24  ;;  %v2718_v23 = vpack.c.bf16 %v1221_v17, %v1220_v16  ;;  %v1204_v24 = vld [vmem:[%s5139_s3 + $0x160] sm:$0xff]  ;;  %v2688_v26 = vpack.c.bf16 %v1173_v22, %v1172_v21  ;;  %v1226_v16 = vld [vmem:[%s5139_s3 + $0x210] sm:$0xff]  ;;  %v1227_v17 = vld [vmem:[%s5139_s3 + $0x218] sm:$0xff] }
 0x108   :  { %2699 = vmatprep.subr.bf16.mxu1 %v2698_v28  ;;  %v2720_v27 = vpack.c.bf16 %v1205_v25, %v1204_v24  ;;  %v1190_v28 = vld [vmem:[%s5139_s3 + $0xf0] sm:$0xff]  ;;  %v1259_v22 = vld [vmem:[%s5139_s3 + $0x318] sm:$0xff]  ;;  %v1245_v24 = vld [vmem:[%s5139_s3 + $0x2a8] sm:$0xff] }
 0x109   :  { %v2690_v31 = vpack.c.bf16 %v1191_v29, %v1190_v28  ;;  %v1277_v28 = vld [vmem:[%s5139_s3 + $0x3a8] sm:$0xff]  ;;  %v2732_v29 = vpack.c.bf16 %v1227_v17, %v1226_v16 }
 0x10a   :  { %2669 = vmatpush3.bf16.msra.mxu0 %v2668_v34  ;;  %v1175_v34 = vld [vmem:[%s5139_s3 + $0x78] sm:$0xff] }
 0x10b   :  { %2701 = vmatpush3.bf16.msra.mxu1 %v2700_v35  ;;  %2671 = vmatprep.subr.bf16.mxu0 %v2670_v36  ;;  %v2722_v35 = vpack.c.bf16 %v1223_v32, %v1222_v30  ;;  %v2692_v36 = vpack.c.bf16 %v1175_v34, %v1174_v33  ;;  %v1228_v32 = vld [vmem:[%s5139_s3 + $0x220] sm:$0xff]  ;;  %v1229_v33 = vld [vmem:[%s5139_s3 + $0x228] sm:$0xff] }
 0x10c   :  { %2703 = vmatprep.subr.bf16.mxu1 %v2702_v40  ;;  %v1240_v40 = vld [vmem:[%s5139_s3 + $0x280] sm:$0xff] }
 0x10d   :  { %v2726_v43 = vpack.c.bf16 %v1241_v41, %v1240_v40  ;;  %v1260_v34 = vld [vmem:[%s5139_s3 + $0x320] sm:$0xff]  ;;  %v1279_v40 = vld [vmem:[%s5139_s3 + $0x3b8] sm:$0xff]  ;;  %v2736_v41 = vpack.c.bf16 %v1229_v33, %v1228_v32  ;;  %v1270_v33 = vld [vmem:[%s5139_s3 + $0x370] sm:$0xff] }
 0x10e   :  { %2673 = vmatpush3.bf16.msra.mxu0 %v2672_v46  ;;  %v560_v46 = vlaneseq }
 0x10f   :  { %2705 = vmatpush3.bf16.msra.mxu1 %v2704_v47  ;;  %2675 = vmatprep.subr.bf16.mxu0 %v2674_v48 }
 0x110   :  { %2707 = vmatprep.subr.bf16.mxu1 %v2706_v52  ;;  %v561_v47 = vshrl.u32 %v560_v46, 7  ;;  %v1262_v46 = vld [vmem:[%s5139_s3 + $0x330] sm:$0xff] }
 0x112   :  { %2677 = vmatpush3.bf16.msra.mxu0 %v2676_v58  ;;  %v562_v48 = vsub.s32 0, %v561_v47  ;;  %v570_v50 = vsub.s32 2, %v561_v47  ;;  %v566_v51 = vsub.s32 1, %v561_v47  ;;  %v574_v52 = vsub.s32 3, %v561_v47 }
 0x113   :  { %2709 = vmatpush3.bf16.msra.mxu1 %v2708_v59  ;;  %2679 = vmatprep.subr.bf16.mxu0 %v2678_v60 }
 0x114   :  { %2711 = vmatprep.subr.bf16.mxu1 %v2710_v0  ;;  %v563_v53 = vrot.slane %v558_v49, %v562_v48  ;;  %v571_v54 = vrot.slane %v558_v49, %v570_v50  ;;  %v567_v55 = vrot.slane %v558_v49, %v566_v51  ;;  %v575_v56 = vrot.slane %v558_v49, %v574_v52  ;;  %v1263_v48 = vld [vmem:[%s5139_s3 + $0x338] sm:$0xff]  ;;  %v1248_v49 = vld [vmem:[%s5139_s3 + $0x2c0] sm:$0xff]  ;;  %v1249_v50 = vld [vmem:[%s5139_s3 + $0x2c8] sm:$0xff] }
 0x115   :  { %v1280_v51 = vld [vmem:[%s5139_s3 + $0x3c0] sm:$0xff]  ;;  %v1281_v52 = vld [vmem:[%s5139_s3 + $0x3c8] sm:$0xff] }
 0x116   :  { %2681 = vmatpush3.bf16.msra.mxu0 %v2680_v6  ;;  %v1243_v6 = vld [vmem:[%s5139_s3 + $0x298] sm:$0xff] }
 0x117   :  { %2713 = vmatpush3.bf16.msra.mxu1 %v2712_v7  ;;  %2683 = vmatprep.subr.bf16.mxu0 %v2682_v8  ;;  %v2730_v21 = vpack.c.bf16 %v1243_v6, %v1242_v5  ;;  %v1234_v6 = vld [vmem:[%s5139_s3 + $0x250] sm:$0xff] }
 0x118   :  { %2715 = vmatprep.subr.bf16.mxu1 %v2714_v12 }
 0x11a   :  { %2685 = vmatpush3.bf16.msra.mxu0 %v2684_v18  ;;  %v1258_v18 = vld [vmem:[%s5139_s3 + $0x310] sm:$0xff] }
 0x11b   :  { %2717 = vmatpush3.bf16.msra.mxu1 %v2716_v19  ;;  %2687 = vmatprep.subr.bf16.mxu0 %v2686_v20  ;;  %v2764_v30 = vpack.c.bf16 %v1259_v22, %v1258_v18  ;;  %v1236_v18 = vld [vmem:[%s5139_s3 + $0x260] sm:$0xff]  ;;  %v1269_v22 = vld [vmem:[%s5139_s3 + $0x368] sm:$0xff] }
 0x11c   :  { %2719 = vmatprep.subr.bf16.mxu1 %v2718_v23  ;;  %v1244_v23 = vld [vmem:[%s5139_s3 + $0x2a0] sm:$0xff] }
 0x11e   :  { %2689 = vmatpush3.bf16.msra.mxu0 %v2688_v26  ;;  %v2762_v26 = vpack.c.bf16 %v1275_v11, %v1274_v10  ;;  %v1267_v10 = vld [vmem:[%s5139_s3 + $0x358] sm:$0xff]  ;;  %v1252_v11 = vld [vmem:[%s5139_s3 + $0x2e0] sm:$0xff] }
 0x11f   :  { %2721 = vmatpush3.bf16.msra.mxu1 %v2720_v27  ;;  %2691 = vmatprep.subr.bf16.mxu0 %v2690_v31  ;;  %v1276_v27 = vld [vmem:[%s5139_s3 + $0x3a0] sm:$0xff]  ;;  %v2734_v31 = vpack.c.bf16 %v1245_v24, %v1244_v23  ;;  %v1254_v23 = vld [vmem:[%s5139_s3 + $0x2f0] sm:$0xff]  ;;  %v1255_v24 = vld [vmem:[%s5139_s3 + $0x2f8] sm:$0xff] }
 0x120   :  { %2723 = vmatprep.subr.bf16.mxu1 %v2722_v35  ;;  %v2766_v35 = vpack.c.bf16 %v1277_v28, %v1276_v27 }
 0x122   :  { %2693 = vmatpush3.bf16.msra.mxu0 %v2692_v36  ;;  %v1261_v36 = vld [vmem:[%s5139_s3 + $0x328] sm:$0xff] }
 0x123   :  { %2725 = vmatpush3.bf16.msra.mxu1 %v2724_v39  ;;  %2727 = vmatprep.subr.bf16.mxu0 %v2726_v43  ;;  %v1278_v39 = vld [vmem:[%s5139_s3 + $0x3b0] sm:$0xff]  ;;  %v2768_v42 = vpack.c.bf16 %v1261_v36, %v1260_v34  ;;  %v2738_v43 = vpack.c.bf16 %v1247_v38, %v1246_v37  ;;  %v1271_v34 = vld [vmem:[%s5139_s3 + $0x378] sm:$0xff] }
 0x124   :  { %2759 = vmatprep.subr.bf16.mxu1 %v2758_v45  ;;  %v1231_v45 = vld [vmem:[%s5139_s3 + $0x238] sm:$0xff]  ;;  %v2770_v47 = vpack.c.bf16 %v1279_v40, %v1278_v39  ;;  %v2788_v37 = vpack.c.bf16 %v1271_v34, %v1270_v33  ;;  %v1692_v34 = vld [vmem:[%s5142_s7 + $0x10] sm:$0xff] }
 0x1d8   :  { %v859_v57 = vpop.f32.mrb[0].mxu0 }
 0x1d9   :  { %v4718_v58 = vadd.f32 %v859_v57, %v563_v53  ;;  %v1143_v59 = vpop.f32.mrb[0].mxu1  ;;  %v861_v60 = vpop.f32.mrb[1].mxu0  ;;  %v2740_v53 = vpack.c.bf16 %v1231_v45, %v1230_v44  ;;  %v1233_v57 = vld [vmem:[%s5139_s3 + $0x248] sm:$0xff]  ;;  %v1596_v44 = vld [vmem:[%s5141_s5 + $0x90] sm:$0xff]  ;;  %v1597_v45 = vld [vmem:[%s5141_s5 + $0x98] sm:$0xff] }
 0x1da   :  { %v4726_v63 = vadd.f32 %v1143_v59, %v571_v54  ;;  %v2867_v0 = vadd.f32 %v861_v60, %v567_v55  ;;  %v1145_v1 = vpop.f32.mrb[1].mxu1  ;;  %v2772_v54 = vpack.c.bf16 %v1263_v48, %v1262_v46  ;;  %v2742_v55 = vpack.c.bf16 %v1249_v50, %v1248_v49  ;;  %v1264_v59 = vld [vmem:[%s5139_s3 + $0x340] sm:$0xff]  ;;  %v1580_v48 = vld [vmem:[%s5141_s5 + $0x10] sm:$0xff]  ;;  %v1581_v49 = vld [vmem:[%s5141_s5 + $0x18] sm:$0xff] }
 0x1db   :  { %v2869_v4 = vadd.f32 %v1145_v1, %v575_v56  ;;  %v1148_v12 = vmax.f32 %v4718_v58, 0.0  ;;  %v1232_v56 = vld [vmem:[%s5139_s3 + $0x240] sm:$0xff]  ;;  %v2774_v60 = vpack.c.bf16 %v1281_v52, %v1280_v51  ;;  %v1282_v1 = vld [vmem:[%s5139_s3 + $0x3d0] sm:$0xff]  ;;  %v1152_v36 = vsub.f32 0.0, %v4718_v58  ;;  %v1595_v58 = vld [vmem:[%s5141_s5 + $0x88] sm:$0xff] }
 0x1dc   :  { %v1149_v7 = vmax.f32 %v2867_v0, 0.0  ;;  %v1153_v8 = vsub.f32 0.0, %v2867_v0  ;;  %v1150_v19 = vmax.f32 %v4726_v63, 0.0  ;;  %v1251_v0 = vld [vmem:[%s5139_s3 + $0x2d8] sm:$0xff]  ;;  %v2744_v3 = vpack.c.bf16 %v1233_v57, %v1232_v56  ;;  %v1598_v50 = vld [vmem:[%s5141_s5 + $0xa0] sm:$0xff]  ;;  %v1599_v51 = vld [vmem:[%s5141_s5 + $0xa8] sm:$0xff] }
 0x1dd   :  { %v1151_v13 = vmax.f32 %v2869_v4, 0.0  ;;  %v1155_v14 = vsub.f32 0.0, %v2869_v4  ;;  %v2776_v4 = vpack.c.bf16 %v1265_v61, %v1264_v59  ;;  %v2746_v5 = vpack.c.bf16 %v1251_v0, %v1250_v62  ;;  %v1600_v56 = vld [vmem:[%s5141_s5 + $0xb0] sm:$0xff]  ;;  %v1601_v57 = vld [vmem:[%s5141_s5 + $0xb8] sm:$0xff]  ;;  %v1602_v0 = vld [vmem:[%s5141_s5 + $0xc0] sm:$0xff] }
 0x1de   :  { %v1157_v20 = vmax.f32 %v1153_v8, 0.0  ;;  %1359 = vmatprep.mubr.f32.mxu0 %v1149_v7  ;;  %v1235_v7 = vld [vmem:[%s5139_s3 + $0x258] sm:$0xff]  ;;  %v1266_v8 = vld [vmem:[%s5139_s3 + $0x350] sm:$0xff]  ;;  %v1154_v38 = vsub.f32 0.0, %v4726_v63  ;;  %v1156_v39 = vmax.f32 %v1152_v36, 0.0  ;;  %v2796_v52 = vpack.c.bf16 %v1581_v49, %v1580_v48  ;;  %v1710_v36 = vld [vmem:[%s5142_s7 + $0xa0] sm:$0xff] }
 0x1df   :  { %v1159_v25 = vmax.f32 %v1155_v14, 0.0  ;;  %1429 = vmatprep.mubr.f32.mxu1 %v1151_v13  ;;  %1360 = vmatmul.mubr.f32.vlgmr.msra.gmra.mrb[2].mxu0 %v1148_v12  ;;  %v1253_v12 = vld [vmem:[%s5139_s3 + $0x2e8] sm:$0xff]  ;;  %v1284_v13 = vld [vmem:[%s5139_s3 + $0x3e0] sm:$0xff]  ;;  %v2780_v16 = vpack.c.bf16 %v1267_v10, %v1266_v8  ;;  %v1584_v61 = vld [vmem:[%s5141_s5 + $0x30] sm:$0xff] }
 0x1e0   :  { %1430 = vmatmul.mubr.f32.vlgmr.msra.gmra.mrb[2].mxu1 %v1150_v19  ;;  %2729 = vmatpush3.bf16.msra.mxu0 %v2728_v9  ;;  %v2778_v9 = vpack.c.bf16 %v1283_v2, %v1282_v1  ;;  %v1285_v14 = vld [vmem:[%s5139_s3 + $0x3e8] sm:$0xff]  ;;  %v2750_v17 = vpack.c.bf16 %v1253_v12, %v1252_v11  ;;  %v1158_v40 = vmax.f32 %v1154_v38, 0.0  ;;  %v1585_v62 = vld [vmem:[%s5141_s5 + $0x38] sm:$0xff]  ;;  %v1588_v10 = vld [vmem:[%s5141_s5 + $0x50] sm:$0xff] }
 0x1e1   :  { %2761 = vmatpush3.bf16.msra.mxu1 %v2760_v15  ;;  %1499 = vmatprep.mubr.f32.mxu0 %v1157_v20  ;;  %v2748_v15 = vpack.c.bf16 %v1235_v7, %v1234_v6  ;;  %v1237_v19 = vld [vmem:[%s5139_s3 + $0x268] sm:$0xff]  ;;  %v1268_v20 = vld [vmem:[%s5139_s3 + $0x360] sm:$0xff]  ;;  %v2804_v2 = vpack.c.bf16 %v1585_v62, %v1584_v61  ;;  %v1604_v7 = vld [vmem:[%s5141_s5 + $0xd0] sm:$0xff] }
 0x1e2   :  { %1569 = vmatprep.mubr.f32.mxu1 %v1159_v25  ;;  %2731 = vmatprep.subr.bf16.mxu0 %v2730_v21  ;;  %v2782_v21 = vpack.c.bf16 %v1285_v14, %v1284_v13  ;;  %v1286_v25 = vld [vmem:[%s5139_s3 + $0x3f0] sm:$0xff]  ;;  %v2752_v27 = vpack.c.bf16 %v1237_v19, %v1236_v18  ;;  %v2784_v28 = vpack.c.bf16 %v1269_v22, %v1268_v20  ;;  %v1603_v1 = vld [vmem:[%s5141_s5 + $0xc8] sm:$0xff]  ;;  %v1605_v8 = vld [vmem:[%s5141_s5 + $0xd8] sm:$0xff] }
 0x1e3   :  { %2763 = vmatprep.subr.bf16.mxu1 %v2762_v26  ;;  %v1287_v26 = vld [vmem:[%s5139_s3 + $0x3f8] sm:$0xff]  ;;  %v1606_v13 = vld [vmem:[%s5141_s5 + $0xe0] sm:$0xff]  ;;  %v1607_v14 = vld [vmem:[%s5141_s5 + $0xe8] sm:$0xff] }
 0x1e4   :  { %2733 = vmatpush3.bf16.msra.mxu0 %v2732_v29  ;;  %v2754_v29 = vpack.c.bf16 %v1255_v24, %v1254_v23  ;;  %v2786_v32 = vpack.c.bf16 %v1287_v26, %v1286_v25  ;;  %v1589_v11 = vld [vmem:[%s5141_s5 + $0x58] sm:$0xff]  ;;  %v1608_v19 = vld [vmem:[%s5141_s5 + $0xf0] sm:$0xff]  ;;  %v1706_v25 = vld [vmem:[%s5142_s7 + $0x80] sm:$0xff] }
 0x1e5   :  { %2765 = vmatpush3.bf16.msra.mxu1 %v2764_v30  ;;  %2735 = vmatprep.subr.bf16.mxu0 %v2734_v31  ;;  %v1238_v30 = vld [vmem:[%s5139_s3 + $0x270] sm:$0xff]  ;;  %v1239_v31 = vld [vmem:[%s5139_s3 + $0x278] sm:$0xff]  ;;  %v2812_v12 = vpack.c.bf16 %v1589_v11, %v1588_v10  ;;  %v1707_v26 = vld [vmem:[%s5142_s7 + $0x88] sm:$0xff] }
 0x1e6   :  { %2767 = vmatprep.subr.bf16.mxu1 %v2766_v35  ;;  %v2756_v35 = vpack.c.bf16 %v1239_v31, %v1238_v30  ;;  %v1609_v20 = vld [vmem:[%s5141_s5 + $0xf8] sm:$0xff]  ;;  %v1592_v22 = vld [vmem:[%s5141_s5 + $0x70] sm:$0xff] }
 0x1e7   :  { %v1593_v23 = vld [vmem:[%s5141_s5 + $0x78] sm:$0xff]  ;;  %v1708_v30 = vld [vmem:[%s5142_s7 + $0x90] sm:$0xff] }
 0x1e8   :  { %2737 = vmatpush3.bf16.msra.mxu0 %v2736_v41  ;;  %v1594_v41 = vld [vmem:[%s5141_s5 + $0x80] sm:$0xff]  ;;  %v2820_v24 = vpack.c.bf16 %v1593_v23, %v1592_v22  ;;  %v1709_v31 = vld [vmem:[%s5142_s7 + $0x98] sm:$0xff]  ;;  %v1720_v23 = vld [vmem:[%s5142_s7 + $0xf0] sm:$0xff] }
 0x1e9   :  { %2769 = vmatpush3.bf16.msra.mxu1 %v2768_v42  ;;  %2739 = vmatprep.subr.bf16.mxu0 %v2738_v43  ;;  %v1578_v42 = vld [vmem:[%s5141_s5] sm:$0xff]  ;;  %v2790_v63 = vpack.c.bf16 %v1595_v58, %v1594_v41  ;;  %v1579_v43 = vld [vmem:[%s5141_s5 + $0x8] sm:$0xff]  ;;  %v2826_v33 = vpack.c.bf16 %v1709_v31, %v1708_v30  ;;  %v1712_v58 = vld [vmem:[%s5142_s7 + $0xb0] sm:$0xff] }
 0x1ea   :  { %2771 = vmatprep.subr.bf16.mxu1 %v2770_v47  ;;  %v2792_v46 = vpack.c.bf16 %v1579_v43, %v1578_v42  ;;  %v2794_v47 = vpack.c.bf16 %v1597_v45, %v1596_v44  ;;  %v1695_v41 = vld [vmem:[%s5142_s7 + $0x28] sm:$0xff]  ;;  %v1713_v42 = vld [vmem:[%s5142_s7 + $0xb8] sm:$0xff]  ;;  %v1696_v44 = vld [vmem:[%s5142_s7 + $0x30] sm:$0xff] }
 0x1eb   :  { %v2834_v43 = vpack.c.bf16 %v1713_v42, %v1712_v58  ;;  %v1697_v45 = vld [vmem:[%s5142_s7 + $0x38] sm:$0xff]  ;;  %v1800_v30 = vld [vmem:[%s5144_s9] sm:$0xff]  ;;  %v1801_v31 = vld [vmem:[%s5144_s9 + $0x8] sm:$0xff] }
 0x1ec   :  { %2741 = vmatpush3.bf16.msra.mxu0 %v2740_v53  ;;  %v2798_v53 = vpack.c.bf16 %v1599_v51, %v1598_v50  ;;  %v2836_v48 = vpack.c.bf16 %v1697_v45, %v1696_v44  ;;  %v1698_v50 = vld [vmem:[%s5142_s7 + $0x40] sm:$0xff]  ;;  %v1699_v51 = vld [vmem:[%s5142_s7 + $0x48] sm:$0xff]  ;;  %v1806_v45 = vld [vmem:[%s5144_s9 + $0x30] sm:$0xff] }
 0x1ed   :  { %2773 = vmatpush3.bf16.msra.mxu1 %v2772_v54  ;;  %2743 = vmatprep.subr.bf16.mxu0 %v2742_v55  ;;  %v1582_v54 = vld [vmem:[%s5141_s5 + $0x20] sm:$0xff]  ;;  %v1583_v55 = vld [vmem:[%s5141_s5 + $0x28] sm:$0xff] }
 0x1ee   :  { %2775 = vmatprep.subr.bf16.mxu1 %v2774_v60  ;;  %v2800_v59 = vpack.c.bf16 %v1583_v55, %v1582_v54  ;;  %v2802_v60 = vpack.c.bf16 %v1601_v57, %v1600_v56  ;;  %v2840_v54 = vpack.c.bf16 %v1699_v51, %v1698_v50  ;;  %v1909_v50 = vld [vmem:[%s5146_s8] ss:$0 sm:$0xff] }
 0x1f0   :  { %2745 = vmatpush3.bf16.msra.mxu0 %v2744_v3  ;;  %v2806_v3 = vpack.c.bf16 %v1603_v1, %v1602_v0 }
 0x1f1   :  { %2777 = vmatpush3.bf16.msra.mxu1 %v2776_v4  ;;  %2747 = vmatprep.subr.bf16.mxu0 %v2746_v5  ;;  %v1586_v4 = vld [vmem:[%s5141_s5 + $0x40] sm:$0xff]  ;;  %v1587_v5 = vld [vmem:[%s5141_s5 + $0x48] sm:$0xff] }
 0x1f2   :  { %2779 = vmatprep.subr.bf16.mxu1 %v2778_v9  ;;  %v2808_v6 = vpack.c.bf16 %v1587_v5, %v1586_v4  ;;  %v2810_v9 = vpack.c.bf16 %v1605_v8, %v1604_v7 }
 0x1f4   :  { %2749 = vmatpush3.bf16.msra.mxu0 %v2748_v15  ;;  %v2814_v15 = vpack.c.bf16 %v1607_v14, %v1606_v13  ;;  %v1700_v14 = vld [vmem:[%s5142_s7 + $0x50] sm:$0xff] }
 0x1f5   :  { %2781 = vmatpush3.bf16.msra.mxu1 %v2780_v16  ;;  %2751 = vmatprep.subr.bf16.mxu0 %v2750_v17  ;;  %v1590_v16 = vld [vmem:[%s5141_s5 + $0x60] sm:$0xff]  ;;  %v1591_v17 = vld [vmem:[%s5141_s5 + $0x68] sm:$0xff] }
 0x1f6   :  { %2783 = vmatprep.subr.bf16.mxu1 %v2782_v21  ;;  %v2816_v18 = vpack.c.bf16 %v1591_v17, %v1590_v16  ;;  %v2818_v21 = vpack.c.bf16 %v1609_v20, %v1608_v19  ;;  %v1718_v17 = vld [vmem:[%s5142_s7 + $0xe0] sm:$0xff] }
 0x1f7   :  { %v1702_v20 = vld [vmem:[%s5142_s7 + $0x60] sm:$0xff] }
 0x1f8   :  { %2753 = vmatpush3.bf16.msra.mxu0 %v2752_v27  ;;  %v1690_v27 = vld [vmem:[%s5142_s7] sm:$0xff] }
 0x1f9   :  { %2785 = vmatpush3.bf16.msra.mxu1 %v2784_v28  ;;  %2755 = vmatprep.subr.bf16.mxu0 %v2754_v29  ;;  %v2822_v28 = vpack.c.bf16 %v1707_v26, %v1706_v25  ;;  %v1691_v29 = vld [vmem:[%s5142_s7 + $0x8] sm:$0xff]  ;;  %v1704_v26 = vld [vmem:[%s5142_s7 + $0x70] sm:$0xff] }
 0x1fa   :  { %2787 = vmatprep.subr.bf16.mxu1 %v2786_v32  ;;  %v2824_v32 = vpack.c.bf16 %v1691_v29, %v1690_v27  ;;  %v1705_v27 = vld [vmem:[%s5142_s7 + $0x78] sm:$0xff]  ;;  %v2887_v29 = vmov 0.0|0.0  }
 0x1fc   :  { %2757 = vmatpush3.bf16.msra.mxu0 %v2756_v35  ;;  %v1693_v35 = vld [vmem:[%s5142_s7 + $0x18] sm:$0xff] }
 0x1fd   :  { %2789 = vmatpush3.bf16.msra.mxu1 %v2788_v37  ;;  %2791 = vmatprep.subr.bf16.mxu0 %v2790_v63  ;;  %v1711_v37 = vld [vmem:[%s5142_s7 + $0xa8] sm:$0xff]  ;;  %v2828_v38 = vpack.c.bf16 %v1693_v35, %v1692_v34  ;;  %v1803_v34 = vld [vmem:[%s5144_s9 + $0x18] sm:$0xff] }
 0x1fe   :  { %2823 = vmatprep.subr.bf16.mxu1 %v2822_v28  ;;  %v2852_v28 = vpack.c.bf16 %v1705_v27, %v1704_v26 }
 0x1ff   :  { %1500 = vmatmul.mubr.f32.vlgmr.msra.gmra.mrb[4].mxu0 %v1156_v39  ;;  %v2830_v39 = vpack.c.bf16 %v1711_v37, %v1710_v36  ;;  %v1908_v37 = vld [vmem:[%s5145_s6] ss:$0 sm:$0xff] }
 0x200   :  { %1570 = vmatmul.mubr.f32.vlgmr.msra.gmra.mrb[4].mxu1 %v1158_v40  ;;  %2793 = vmatpush3.bf16.msra.mxu0 %v2792_v46  ;;  %v1694_v40 = vld [vmem:[%s5142_s7 + $0x20] sm:$0xff] }
 0x201   :  { %2795 = vmatprep.subr.bf16.mxu0 %v2794_v47  ;;  %2825 = vmatpush3.bf16.msra.mxu1 %v2824_v32  ;;  %v2832_v63 = vpack.c.bf16 %v1695_v41, %v1694_v40  ;;  %v1714_v46 = vld [vmem:[%s5142_s7 + $0xc0] sm:$0xff]  ;;  %v1715_v47 = vld [vmem:[%s5142_s7 + $0xc8] sm:$0xff]  ;;  %v1802_v32 = vld [vmem:[%s5144_s9 + $0x10] sm:$0xff] }
 0x202   :  { %2827 = vmatprep.subr.bf16.mxu1 %v2826_v33  ;;  %v2838_v49 = vpack.c.bf16 %v1715_v47, %v1714_v46  ;;  %v2855_v33 = vpack.c.bf16 %v1801_v31, %v1800_v30  ;;  %v2858_v35 = vpack.c.bf16 %v1803_v34, %v1802_v32  ;;  %v1807_v46 = vld [vmem:[%s5144_s9 + $0x38] sm:$0xff] }
 0x203   :  { %v2864_v47 = vpack.c.bf16 %v1807_v46, %v1806_v45 }
 0x204   :  { %2797 = vmatpush3.bf16.msra.mxu0 %v2796_v52  ;;  %v1716_v52 = vld [vmem:[%s5142_s7 + $0xd0] sm:$0xff] }
 0x205   :  { %2799 = vmatprep.subr.bf16.mxu0 %v2798_v53  ;;  %2829 = vmatpush3.bf16.msra.mxu1 %v2828_v38  ;;  %v1717_v53 = vld [vmem:[%s5142_s7 + $0xd8] sm:$0xff] }
 0x206   :  { %2831 = vmatprep.subr.bf16.mxu1 %v2830_v39  ;;  %v2842_v55 = vpack.c.bf16 %v1717_v53, %v1716_v52 }
 0x208   :  { %2801 = vmatpush3.bf16.msra.mxu0 %v2800_v59  ;;  %v1907_v59 = vld [vmem:[%s5143_s4] ss:$0 sm:$0xff] }
 0x209   :  { %2803 = vmatprep.subr.bf16.mxu0 %v2802_v60  ;;  %2833 = vmatpush3.bf16.msra.mxu1 %v2832_v63  ;;  %v1804_v63 = vld [vmem:[%s5144_s9 + $0x20] sm:$0xff] }
 0x20a   :  { %2835 = vmatprep.subr.bf16.mxu1 %v2834_v43  ;;  %v1805_v43 = vld [vmem:[%s5144_s9 + $0x28] sm:$0xff] }
 0x20b   :  { %v2861_v44 = vpack.c.bf16 %v1805_v43, %v1804_v63 }
 0x20c   :  { %2805 = vmatpush3.bf16.msra.mxu0 %v2804_v2 }
 0x20d   :  { %2807 = vmatprep.subr.bf16.mxu0 %v2806_v3  ;;  %2837 = vmatpush3.bf16.msra.mxu1 %v2836_v48  ;;  %v2889_v48 = vmov 0.0  }
 0x20e   :  { %2839 = vmatprep.subr.bf16.mxu1 %v2838_v49 }
 0x210   :  { %2809 = vmatpush3.bf16.msra.mxu0 %v2808_v6 }
 0x211   :  { %2811 = vmatprep.subr.bf16.mxu0 %v2810_v9  ;;  %2841 = vmatpush3.bf16.msra.mxu1 %v2840_v54 }
 0x212   :  { %2843 = vmatprep.subr.bf16.mxu1 %v2842_v55  ;;  %v2890_v55 = vmov 6  }
 0x213   :  { %2886 = vset.pattern.permute.xlu0 %v2890_v55 }
 0x214   :  { %2813 = vmatpush3.bf16.msra.mxu0 %v2812_v12 }
 0x215   :  { %2815 = vmatprep.subr.bf16.mxu0 %v2814_v15  ;;  %v1701_v15 = vld [vmem:[%s5142_s7 + $0x58] sm:$0xff] }
 0x216   :  { %v2844_v16 = vpack.c.bf16 %v1701_v15, %v1700_v14 }
 0x218   :  { %2817 = vmatpush3.bf16.msra.mxu0 %v2816_v18  ;;  %2845 = vmatpush3.bf16.msra.mxu1 %v2844_v16  ;;  %v1719_v18 = vld [vmem:[%s5142_s7 + $0xe8] sm:$0xff] }
 0x219   :  { %2819 = vmatprep.subr.bf16.mxu0 %v2818_v21  ;;  %v2846_v19 = vpack.c.bf16 %v1719_v18, %v1718_v17  ;;  %v1703_v21 = vld [vmem:[%s5142_s7 + $0x68] sm:$0xff] }
 0x21a   :  { %v2848_v22 = vpack.c.bf16 %v1703_v21, %v1702_v20 }
 0x21b   :  { %2847 = vmatprep.subr.bf16.mxu1 %v2846_v19 }
 0x21c   :  { %2821 = vmatpush3.bf16.msra.mxu0 %v2820_v24  ;;  %2849 = vmatpush3.bf16.msra.mxu1 %v2848_v22  ;;  %v1721_v24 = vld [vmem:[%s5142_s7 + $0xf8] sm:$0xff] }
 0x21d   :  { %v2850_v25 = vpack.c.bf16 %v1721_v24, %v1720_v23  ;;  %2854 = vmatprep.subr.bf16.mxu0 %v2887_v29 }
 0x21f   :  { %2851 = vmatprep.subr.bf16.mxu1 %v2850_v25 }
 0x220   :  { %2853 = vmatpush3.bf16.msra.mxu1 %v2852_v28 }
 0x2b2   :  { %v1944_v56 = vpop.f32.mrb[2].mxu0 }
 0x2b3   :  { %v1979_v57 = vpop.f32.mrb[2].mxu1  ;;  %v1945_v60 = vpop.f32.mrb[3].mxu0 }
 0x2b4   :  { %v1946_v61 = vadd.f32 %v1945_v60, %v1944_v56  ;;  %v1980_v62 = vpop.f32.mrb[3].mxu1  ;;  %v1910_v56 = vld [vmem:[%s5147_s10] ss:$0 sm:$0xff] }
 0x2b5   :  { %v1981_v0 = vadd.f32 %v1980_v62, %v1979_v57 }
 0x2b6   :  { %v1362_v1 = vadd.f32 %v1946_v61, %v1907_v59 }
 0x2b8   :  { %v1432_v2 = vadd.f32 %v1981_v0, %v1362_v1 }
 0x2d2   :  { %v2014_v3 = vpop.f32.mrb[4].mxu0 }
 0x2d3   :  { %v2049_v4 = vpop.f32.mrb[4].mxu1  ;;  %v2015_v5 = vpop.f32.mrb[5].mxu0 }
 0x2d4   :  { %v2016_v6 = vadd.f32 %v2015_v5, %v2014_v3  ;;  %v2050_v7 = vpop.f32.mrb[5].mxu1 }
 0x2d5   :  { %v2051_v8 = vadd.f32 %v2050_v7, %v2049_v4 }
 0x2d6   :  { %v1502_v9 = vadd.f32 %v2016_v6, %v1432_v2 }
 0x2d8   :  { %v1572_v10 = vadd.f32 %v2051_v8, %v1502_v9 }
 0x2da   :  { %v1576_v11 = vsub.f32 0.0, %v1572_v10  ;;  %v1575_v13 = vmax.f32 %v1572_v10, 0.0 }
 0x2dc   :  { %v1577_v12 = vmax.f32 %v1576_v11, 0.0 }
 0x2de   :  { %1681 = vmatprep.mubr.f32.mxu0 %v1577_v12 }
 0x2df   :  { %1682 = vmatmul.mubr.f32.vlgmr.msra.gmra.mrb[6].mxu0 %v1575_v13 }
 0x2e0   :  { %2856 = vmatpush3.bf16.msra.mxu0 %v2855_v33  ;;  %2147 = vmatprep.mubr.msk.f32.mxu0 %vm2888_vm0, %v2889_v48 }
 0x2e1   :  { %2857 = vmatprep.subr.bf16.mxu0 %v2887_v29 }
 0x2e4   :  { %2859 = vmatpush3.bf16.msra.mxu0 %v2858_v35 }
 0x2e5   :  { %2860 = vmatprep.subr.bf16.mxu0 %v2887_v29 }
 0x2e8   :  { %2862 = vmatpush3.bf16.msra.mxu0 %v2861_v44 }
 0x2e9   :  { %2863 = vmatprep.subr.bf16.mxu0 %v2887_v29 }
 0x2ec   :  { %2865 = vmatpush3.bf16.msra.mxu0 %v2864_v47 }
 0x3b2   :  { %v2084_v36 = vpop.f32.mrb[6].mxu0 }
 0x3b3   :  { %v2085_v38 = vpop.f32.mrb[7].mxu0 }
 0x3b4   :  { %v2086_v39 = vadd.f32 %v2085_v38, %v2084_v36 }
 0x3b6   :  { %v1684_v40 = vadd.f32 %v2086_v39, %v1908_v37 }
 0x3b8   :  { %v1688_v41 = vsub.f32 0.0, %v1684_v40  ;;  %v1687_v42 = vmax.f32 %v1684_v40, 0.0 }
 0x3ba   :  { %v1689_v58 = vmax.f32 %v1688_v41, 0.0 }
 0x3bc   :  { %1793 = vmatprep.mubr.f32.mxu1 %v1689_v58 }
 0x3bd   :  { %1794 = vmatmul.mubr.f32.vlgmr.msra.gmra.mrb[6].mxu1 %v1687_v42 }
 0x490   :  { %v2119_v49 = vpop.f32.mrb[6].mxu1 }
 0x491   :  { %v2120_v51 = vpop.f32.mrb[7].mxu1 }
 0x492   :  { %v2121_v52 = vadd.f32 %v2120_v51, %v2119_v49 }
 0x494   :  { %v1796_v53 = vadd.f32 %v2121_v52, %v1909_v50 }
 0x496   :  { %v1799_v54 = vmax.f32 %v1796_v53, 0.0 }
 0x498   :  { %2148 = vmatmul.mubr.msk.f32.vlgmr.msra.gmra.mrb[8].mxu0 %vm1815_vm1, %v1799_v54 }
 0x56b   :  { %v1885_v57 = vpop.f32.mrb[8].mxu0 }
 0x56c   :  { %v1886_v59 = vadd.f32 %v1910_v56, %v1885_v57  ;;  %v2149_v60 = vpop.f32.mrb[9].mxu0 }
 0x56e   :  { %v1896_v61 = vsel %vm1895_vm2, %v1886_v59, 0.0 }
 0x56f   :  { %1897 = vadd.xlane.f32.xlu0 %v1896_v61 }
 0x585   :  { %1891 = vperm.xlu0 %2886, %v1886_v59  }
 0x5fc   :  { %v1898_v62 = vpop.xlane.xlu0 %1897 }
 0x5fd   :  { %v1900_v1 = vmul.f32 0.16666667, %v1898_v62 }
 0x604   :  { %v1892_v0 = vpop.permute.xlu0 %1891 }
 0x605   :  { %v1894_v2 = vadd.f32 %v1892_v0, %v1886_v59 }
 0x607   :  { %v1901_v3 = vsub.f32 %v1894_v2, %v1900_v1 }
 0x609   :  { %1902 = vst.msk [vmem:[%s5148_s11] sm:$0xff] %vm1895_vm2, %v1901_v3 }

</bundles_post_ra>
